<compile_context>
chip_gen: v6e
topology: v6e:2x2x1
jax: 0.10.0
libtpu: 0.0.40
codegen_flags: <defaults>
</compile_context>

<pallas_src>
import functools
import numpy as np
import jax
import jax.numpy as jnp
from jax import lax
from jax.experimental import pallas as pl
from jax.experimental.pallas import tpu as pltpu


# --------------------------------------------------------------------------- #
# Host-side parameter packing (done ONCE at parameter load, reused per call).
# All weights pre-transposed to [in, out]; enc_whh and aw1 concatenated along
# lanes; dec_wih/dec_whh stacked along the contraction axis.
# --------------------------------------------------------------------------- #
def pack_params(params):
    T = jnp.transpose
    p = params
    entries = [
        ("ew1",          T(p["ew1"])),                                   # [ef*C, H]
        ("eb1",          p["eb1"]),                                      # [1, H]
        ("pa",           p["pa"]),                                       # [1, 1]
        ("ew2",          T(p["ew2"])),                                   # [H, H]
        ("eb2",          p["eb2"]),                                      # [1, H]
        ("enc_wih",      T(p["enc_wih"])),                               # [C, 4H]
        ("enc_whh_aw1",  jnp.concatenate([T(p["enc_whh"]), T(p["aw1"])],
                                         axis=1)),                       # [H, 5H]
        ("enc_b",        p["enc_b"]),                                    # [1, 4H]
        ("dec_w",        jnp.concatenate([T(p["dec_wih"]), T(p["dec_whh"])],
                                         axis=0)),                       # [C+H, 4H]
        ("dec_b",        p["dec_b"]),                                    # [1, 4H]
        ("aw2",          T(p["aw2"])),                                   # [H, H]
        ("av",           p["av"]),                                       # [1, H]
        ("d0",           p["d0"]),                                       # [1, C]
    ]
    lane_w = max(int(a.shape[1]) for _, a in entries)
    blocks, offs, r = [], {}, 0
    for name, a in entries:
        a = jnp.asarray(a, jnp.float32)
        nr, nc = int(a.shape[0]), int(a.shape[1])
        offs[name] = (r, nr, nc)
        nr8 = ((nr + 7) // 8) * 8                      # sublane-aligned rows
        blk = jnp.zeros((nr8, lane_w), jnp.float32).at[:nr, :nc].set(a)
        blocks.append(blk)
        r += nr8
    slab = jnp.concatenate(blocks, axis=0)             # [R, lane_w]
    return slab, offs


# --------------------------------------------------------------------------- #
# Pallas kernel: entire PointerNetHidden forward in one invocation.
#   refs: x_ref [B,Li,C], slab_ref [R,LW] (packed params),
#         out_ref [Lo,B,Le] (per-step logits), w1_ref VMEM scratch [B,Le,H].
# --------------------------------------------------------------------------- #
def _pointer_net_kernel(dims, offs, x_ref, slab_ref, out_ref, w1_ref):
    B, Li, C, ef, Lo, H = dims
    Le = Li - ef
    f32 = jnp.float32

    def P(name):
        r0, nr, nc = offs[name]
        return slab_ref[r0:r0 + nr, 0:nc]

    x = x_ref[...]

    # ---- embedding_hidden: Linear -> PReLU -> Dropout(p=0) -> Linear => h0 ---
    x_pref = x[:, :ef, :].reshape(B, ef * C)                              # [B, ef*C]
    z = jnp.dot(x_pref, P("ew1"), preferred_element_type=f32) + P("eb1")
    alpha = P("pa")[0, 0]
    z = jnp.where(z > 0, z, alpha * z)                                    # PReLU
    h = jnp.dot(z, P("ew2"), preferred_element_type=f32) + P("eb2")       # h0 [B,H]
    c = jnp.zeros_like(h)                                                 # c0

    # ---- encoder LSTM over x[:, ef:, :] ------------------------------------
    x_enc = x[:, ef:, :]                                                  # [B, Le, C]
    # input projections + bias hoisted out of the recurrence (one matmul)
    gx = (jnp.dot(x_enc.reshape(B * Le, C), P("enc_wih"),
                  preferred_element_type=f32)
          + P("enc_b")).reshape(B, Le, 4 * H)                             # [B, Le, 4H]

    enc_whh_aw1 = P("enc_whh_aw1")                                        # [H, 5H]
    for t in range(Le):
        # recurrent gates + attention-W1 projection of the previous hidden,
        # fused into one MXU pass (160 cols).
        rec = jnp.dot(h, enc_whh_aw1, preferred_element_type=f32)         # [B, 5H]
        if t >= 1:
            w1_ref[:, t - 1, :] = rec[:, 4 * H:]                          # W1(h_{t-1})
        g = gx[:, t, :] + rec[:, :4 * H]
        sg = jax.nn.sigmoid(g)                                            # 1 EUP push
        tg = jnp.tanh(g)                                                  # 1 EUP push
        i, f = sg[:, 0 * H:1 * H], sg[:, 1 * H:2 * H]
        gg, o = tg[:, 2 * H:3 * H], sg[:, 3 * H:4 * H]
        c = f * c + i * gg
        h = o * jnp.tanh(c)
    # W1 projection of the last encoder hidden (only one not covered by fold)
    w1_ref[:, Le - 1, :] = jnp.dot(h, enc_whh_aw1[:, 4 * H:],
                                   preferred_element_type=f32)
    w1_enc = w1_ref[...]                                                  # [B, Le, H]

    # ---- decoder LSTM + pointer attention ----------------------------------
    dec_w = P("dec_w")                                                    # [C+H, 4H]
    aw2 = P("aw2")                                                        # [H, H]
    # loop-invariant broadcasts hoisted out of the unrolled Lo loop
    dec_bb = jnp.broadcast_to(P("dec_b"), (B, 4 * H))
    av_b = jnp.broadcast_to(P("av").reshape(1, 1, H), (B, Le, H))
    iota = lax.broadcasted_iota(jnp.int32, (B, Le), 1)

    dh, dc = h, c                                                         # enc final state
    dec_in = jnp.broadcast_to(P("d0"), (B, C))                            # decoder_input0
    for s in range(Lo):
        # fused gate matmul: [dec_in | dh] @ [W_ih ; W_hh]  (40 x 128)
        zin = jnp.concatenate([dec_in, dh], axis=-1)                      # [B, C+H]
        g = jnp.dot(zin, dec_w, preferred_element_type=f32) + dec_bb
        sg = jax.nn.sigmoid(g)
        tg = jnp.tanh(g)
        i, f = sg[:, 0 * H:1 * H], sg[:, 1 * H:2 * H]
        gg, o = tg[:, 2 * H:3 * H], sg[:, 3 * H:4 * H]
        dc = f * dc + i * gg
        dh = o * jnp.tanh(dc)

        # additive attention: one broadcast tanh + single lane reduction
        dec_proj = jnp.dot(dh, aw2, preferred_element_type=f32)           # [B, H]
        t_act = jnp.tanh(w1_enc + dec_proj[:, None, :])                   # [B, Le, H]
        logit_step = jnp.sum(t_act * av_b, axis=-1)                       # [B, Le]
        out_ref[s] = logit_step                                           # [Lo, B, Le]

        # first-occurrence argmax -> one-hot gather of next decoder input
        mx = jnp.max(logit_step, axis=-1, keepdims=True)
        idx = jnp.min(jnp.where(logit_step == mx, iota, Le),
                      axis=-1, keepdims=True)
        onehot = (iota == idx).astype(f32)                                # [B, Le]
        dec_in = jnp.sum(onehot[:, :, None] * x_enc, axis=1)              # [B, C]


def pointer_net_forward(x, packed, *, exclude_first, output_length, hidden_dim):
    """Full PointerNetHidden forward.  All data (a few hundred KB) fits VMEM,
    so a single grid-less invocation with whole-array VMEM blocks is used."""
    slab, offs = packed
    B, Li, C = x.shape
    ef, Lo, H = exclude_first, output_length, hidden_dim
    Le = Li - ef

    kernel = functools.partial(_pointer_net_kernel, (B, Li, C, ef, Lo, H), offs)
    vmem = pl.BlockSpec(memory_space=pltpu.MemorySpace.VMEM)
    # TODO(synk): at production batch sizes, add a batch grid axis with
    #   dimension_semantics=("parallel",) (2-TC megacore on v7x), size the
    #   batch tile for v7x's 64 MiB VMEM, and cast matmul inputs to bf16
    #   (keep logits / argmax in f32) for the 256-wide MXU on v6e/v7x.
    step_logits = pl.pallas_call(
        kernel,
        out_shape=jax.ShapeDtypeStruct((Lo, B, Le), jnp.float32),
        in_specs=[vmem, vmem],
        out_specs=vmem,
        scratch_shapes=[pltpu.VMEM((B, Le, H), jnp.float32)],
    )(x, slab)

    logits_enc = jnp.transpose(step_logits, (1, 2, 0))                    # [B, Le, Lo]
    zeros_pref = jnp.zeros((B, ef, Lo), dtype=logits_enc.dtype)
    return jnp.concatenate([zeros_pref, logits_enc], axis=1)              # [B, Li, Lo]


# --------------------------------------------------------------------------- #
# Pure-JAX reference: direct (unoptimized) port of PointerNetHidden.forward.
# Uses the original [out, in] weight layout; independent of the kernel math.
# --------------------------------------------------------------------------- #
def _pointer_net_reference(x, p, *, ef, Lo, H):
    def sig(v):
        return 1.0 / (1.0 + jnp.exp(-v))

    B, Li, C = x.shape
    Le = Li - ef

    x_pref = jnp.concatenate([x[:, t, :] for t in range(ef)], axis=-1)
    z = jnp.dot(x_pref, p["ew1"].T) + p["eb1"]
    a = p["pa"][0, 0]
    z = jnp.maximum(z, 0.0) + a * jnp.minimum(z, 0.0)
    h = jnp.dot(z, p["ew2"].T) + p["eb2"]
    c = jnp.zeros_like(h)

    enc_xs, enc_hs = [], []
    for t in range(Le):
        xt = x[:, ef + t, :]
        enc_xs.append(xt)
        g = jnp.dot(xt, p["enc_wih"].T) + jnp.dot(h, p["enc_whh"].T) + p["enc_b"]
        i, f = sig(g[:, 0 * H:1 * H]), sig(g[:, 1 * H:2 * H])
        gg, o = jnp.tanh(g[:, 2 * H:3 * H]), sig(g[:, 3 * H:4 * H])
        c = f * c + i * gg
        h = o * jnp.tanh(c)
        enc_hs.append(h)

    w1_enc = [jnp.dot(eh, p["aw1"].T) for eh in enc_hs]

    dh, dc = h, c
    dec_in = jnp.broadcast_to(p["d0"], (B, C))
    step_logits = []
    for _ in range(Lo):
        g = jnp.dot(dec_in, p["dec_wih"].T) + jnp.dot(dh, p["dec_whh"].T) + p["dec_b"]
        i, f = sig(g[:, 0 * H:1 * H]), sig(g[:, 1 * H:2 * H])
        gg, o = jnp.tanh(g[:, 2 * H:3 * H]), sig(g[:, 3 * H:4 * H])
        dc = f * dc + i * gg
        dh = o * jnp.tanh(dc)

        dec_proj = jnp.dot(dh, p["aw2"].T)
        scores = [jnp.sum(jnp.tanh(w1_enc[t] + dec_proj) * p["av"],
                          axis=-1, keepdims=True) for t in range(Le)]
        logit_step = jnp.concatenate(scores, axis=-1)
        step_logits.append(logit_step)

        mx = jnp.max(logit_step, axis=-1, keepdims=True)
        iota = lax.broadcasted_iota(jnp.int32, (B, Le), 1)
        idx = jnp.min(jnp.where(logit_step == mx, iota, Le), axis=-1, keepdims=True)
        onehot = (iota == idx).astype(x.dtype)
        dec_in = sum(onehot[:, t:t + 1] * enc_xs[t] for t in range(Le))

    logits_enc = jnp.stack(step_logits, axis=-1)
    zeros_pref = jnp.zeros((B, ef, Lo), dtype=logits_enc.dtype)
    return jnp.concatenate([zeros_pref, logits_enc], axis=1)


# --------------------------------------------------------------------------- #
# Synthetic parameters (shapes implied by PointerNetHidden.__init__).
# --------------------------------------------------------------------------- #
def init_params(key, *, input_dim, hidden_dim, exclude_first, lstm_layers=1):
    C, H, ef, N = input_dim, hidden_dim, exclude_first, lstm_layers
    ks = jax.random.split(key, 14)
    nrm = lambda k, shape, s=0.2: (s * jax.random.normal(k, shape)).astype(jnp.float32)
    return {
        # embedding_hidden: Linear(C*ef, H) -> PReLU -> Dropout -> Linear(H, H)
        "ew1": nrm(ks[0], (H, C * ef)),
        "eb1": nrm(ks[1], (1, H)),
        "pa":  jnp.full((1, 1), 0.25, jnp.float32),          # PReLU default slope
        "ew2": nrm(ks[2], (H, H)),
        "eb2": nrm(ks[3], (1, H)),
        # encoder LSTM(C -> H), 1 layer.  b_ih + b_hh folded into one bias.
        "enc_wih": nrm(ks[4], (4 * H, C)),
        "enc_whh": nrm(ks[5], (4 * H, H)),
        "enc_b":   nrm(ks[6], (1, 4 * H)),
        # decoder LSTM(C -> H), 1 layer
        "dec_wih": nrm(ks[7], (4 * H, C)),
        "dec_whh": nrm(ks[8], (4 * H, H)),
        "dec_b":   nrm(ks[9], (1, 4 * H)),
        # attention: W1(H,H), W2(N*H,H), V(H,1)
        "aw1": nrm(ks[10], (H, H)),
        "aw2": nrm(ks[11], (H, N * H)),
        "av":  nrm(ks[12], (1, H)),
        # decoder_input0 ~ U[0,1), as torch.nn.init.uniform_
        "d0":  jax.random.uniform(ks[13], (1, C), jnp.float32),
    }


if __name__ == "__main__":
    B, Li, C = 2, 8, 8
    H, ef, Lo, N = 32, 2, 4, 1

    key = jax.random.PRNGKey(0)
    kx, kp = jax.random.split(key)
    x = jax.random.normal(kx, (B, Li, C), jnp.float32)
    params = init_params(kp, input_dim=C, hidden_dim=H, exclude_first=ef, lstm_layers=N)

    # Pack (and transpose) the parameters ONCE; reused across forward calls.
    packed = pack_params(params)
    packed = (jax.block_until_ready(packed[0]), packed[1])

    logits = pointer_net_forward(x, packed, exclude_first=ef,
                                 output_length=Lo, hidden_dim=H)
    logits = jax.block_until_ready(logits)

    # Independent pure-JAX reference (unoptimized port of the PyTorch forward).
    ref = _pointer_net_reference(x, params, ef=ef, Lo=Lo, H=H)
    assert logits.shape == (B, Li, Lo)
    assert bool(jnp.all(jnp.isfinite(logits)))
    np.testing.assert_allclose(np.asarray(logits), np.asarray(ref),
                               rtol=1e-3, atol=1e-3)

    print("KERNEL_OK")
</pallas_src>

<mosaic_0001>
module attributes {stable_mosaic.version = 11 : i64} {
  func.func @_pointer_net_kernel(%arg0: memref<2x8x8xf32, #tpu.memory_space<vmem>>, %arg1: memref<216x160xf32, #tpu.memory_space<vmem>>, %arg2: memref<4x2x6xf32, #tpu.memory_space<vmem>>, %arg3: memref<2x6x32xf32, #tpu.memory_space<vmem>>) attributes {dimension_semantics = [], scalar_prefetch = 0 : i64, scratch_operands = 1 : i64, tpu.core_type = #tpu.core_type<tc>} {
    %c0 = arith.constant 0 : index
    %c0_0 = arith.constant 0 : index
    %c0_1 = arith.constant 0 : index
    %0 = vector.load %arg0[%c0, %c0_0, %c0_1] : memref<2x8x8xf32, #tpu.memory_space<vmem>>, vector<2x8x8xf32>
    %1 = vector.extract_strided_slice %0 {offsets = [0, 0, 0], sizes = [2, 2, 8], strides = [1, 1, 1]} : vector<2x8x8xf32> to vector<2x2x8xf32>
    %2 = vector.shape_cast %1 : vector<2x2x8xf32> to vector<2x16xf32>
    %c0_2 = arith.constant 0 : index
    %c0_3 = arith.constant 0 : index
    %3 = vector.load %arg1[%c0_2, %c0_3] : memref<216x160xf32, #tpu.memory_space<vmem>>, vector<16x32xf32>
    %cst = arith.constant dense<0.000000e+00> : vector<2x32xf32>
    %4 = tpu.matmul %2, %3, %cst {dimension_numbers = #tpu.dot_dimension_numbers<[1], [0], [0], [1], [0, 0, 1, 1], [], []>} : vector<2x16xf32>, vector<16x32xf32>, vector<2x32xf32> -> vector<2x32xf32>
    %c16 = arith.constant 16 : index
    %c0_4 = arith.constant 0 : index
    %5 = vector.load %arg1[%c16, %c0_4] : memref<216x160xf32, #tpu.memory_space<vmem>>, vector<1x32xf32>
    %6 = vector.broadcast %5 : vector<1x32xf32> to vector<2x32xf32>
    %7 = arith.addf %4, %6 : vector<2x32xf32>
    %c24 = arith.constant 24 : index
    %c0_5 = arith.constant 0 : index
    %8 = vector.load %arg1[%c24, %c0_5] : memref<216x160xf32, #tpu.memory_space<vmem>>, vector<1x1xf32>
    %9 = vector.extract %8[0, 0] : f32 from vector<1x1xf32>
    %cst_6 = arith.constant 0.000000e+00 : f32
    %10 = vector.broadcast %cst_6 : f32 to vector<2x32xf32>
    %11 = arith.cmpf ogt, %7, %10 : vector<2x32xf32>
    %12 = vector.broadcast %9 : f32 to vector<2x32xf32>
    %13 = arith.mulf %12, %7 : vector<2x32xf32>
    %14 = arith.select %11, %7, %13 : vector<2x32xi1>, vector<2x32xf32>
    %c32 = arith.constant 32 : index
    %c0_7 = arith.constant 0 : index
    %15 = vector.load %arg1[%c32, %c0_7] : memref<216x160xf32, #tpu.memory_space<vmem>>, vector<32x32xf32>
    %cst_8 = arith.constant dense<0.000000e+00> : vector<2x32xf32>
    %16 = tpu.matmul %14, %15, %cst_8 {dimension_numbers = #tpu.dot_dimension_numbers<[1], [0], [0], [1], [0, 0, 1, 1], [], []>} : vector<2x32xf32>, vector<32x32xf32>, vector<2x32xf32> -> vector<2x32xf32>
    %c64 = arith.constant 64 : index
    %c0_9 = arith.constant 0 : index
    %17 = vector.load %arg1[%c64, %c0_9] : memref<216x160xf32, #tpu.memory_space<vmem>>, vector<1x32xf32>
    %18 = vector.broadcast %17 : vector<1x32xf32> to vector<2x32xf32>
    %19 = arith.addf %16, %18 : vector<2x32xf32>
    %cst_10 = arith.constant 0.000000e+00 : f32
    %20 = vector.broadcast %cst_10 : f32 to vector<2x32xf32>
    %21 = vector.extract_strided_slice %0 {offsets = [0, 2, 0], sizes = [2, 6, 8], strides = [1, 1, 1]} : vector<2x8x8xf32> to vector<2x6x8xf32>
    %22 = vector.shape_cast %21 : vector<2x6x8xf32> to vector<12x8xf32>
    %c72 = arith.constant 72 : index
    %c0_11 = arith.constant 0 : index
    %23 = vector.load %arg1[%c72, %c0_11] : memref<216x160xf32, #tpu.memory_space<vmem>>, vector<8x128xf32>
    %cst_12 = arith.constant dense<0.000000e+00> : vector<12x128xf32>
    %24 = tpu.matmul %22, %23, %cst_12 {dimension_numbers = #tpu.dot_dimension_numbers<[1], [0], [0], [1], [0, 0, 1, 1], [], []>} : vector<12x8xf32>, vector<8x128xf32>, vector<12x128xf32> -> vector<12x128xf32>
    %c112 = arith.constant 112 : index
    %c0_13 = arith.constant 0 : index
    %25 = vector.load %arg1[%c112, %c0_13] : memref<216x160xf32, #tpu.memory_space<vmem>>, vector<1x128xf32>
    %26 = vector.broadcast %25 : vector<1x128xf32> to vector<12x128xf32>
    %27 = arith.addf %24, %26 : vector<12x128xf32>
    %28 = vector.shape_cast %27 : vector<12x128xf32> to vector<2x6x128xf32>
    %c80 = arith.constant 80 : index
    %c0_14 = arith.constant 0 : index
    %29 = vector.load %arg1[%c80, %c0_14] : memref<216x160xf32, #tpu.memory_space<vmem>>, vector<32x160xf32>
    %cst_15 = arith.constant dense<0.000000e+00> : vector<2x160xf32>
    %30 = tpu.matmul %19, %29, %cst_15 {dimension_numbers = #tpu.dot_dimension_numbers<[1], [0], [0], [1], [0, 0, 1, 1], [], []>} : vector<2x32xf32>, vector<32x160xf32>, vector<2x160xf32> -> vector<2x160xf32>
    %31 = vector.extract_strided_slice %28 {offsets = [0, 0, 0], sizes = [2, 1, 128], strides = [1, 1, 1]} : vector<2x6x128xf32> to vector<2x1x128xf32>
    %32 = vector.shape_cast %31 : vector<2x1x128xf32> to vector<2x128xf32>
    %33 = vector.extract_strided_slice %30 {offsets = [0, 0], sizes = [2, 128], strides = [1, 1]} : vector<2x160xf32> to vector<2x128xf32>
    %34 = arith.addf %32, %33 : vector<2x128xf32>
    %35 = arith.negf %34 : vector<2x128xf32>
    %36 = math.exp %35 : vector<2x128xf32>
    %cst_16 = arith.constant 1.000000e+00 : f32
    %37 = vector.broadcast %cst_16 : f32 to vector<2x128xf32>
    %38 = arith.addf %37, %36 : vector<2x128xf32>
    %39 = arith.divf %37, %38 : vector<2x128xf32>
    %40 = math.tanh %34 : vector<2x128xf32>
    %41 = vector.extract_strided_slice %39 {offsets = [0, 0], sizes = [2, 32], strides = [1, 1]} : vector<2x128xf32> to vector<2x32xf32>
    %42 = vector.extract_strided_slice %39 {offsets = [0, 32], sizes = [2, 32], strides = [1, 1]} : vector<2x128xf32> to vector<2x32xf32>
    %43 = vector.extract_strided_slice %40 {offsets = [0, 64], sizes = [2, 32], strides = [1, 1]} : vector<2x128xf32> to vector<2x32xf32>
    %44 = vector.extract_strided_slice %39 {offsets = [0, 96], sizes = [2, 32], strides = [1, 1]} : vector<2x128xf32> to vector<2x32xf32>
    %45 = arith.mulf %42, %20 : vector<2x32xf32>
    %46 = arith.mulf %41, %43 : vector<2x32xf32>
    %47 = arith.addf %45, %46 : vector<2x32xf32>
    %48 = math.tanh %47 : vector<2x32xf32>
    %49 = arith.mulf %44, %48 : vector<2x32xf32>
    %cst_17 = arith.constant dense<0.000000e+00> : vector<2x160xf32>
    %50 = tpu.matmul %49, %29, %cst_17 {dimension_numbers = #tpu.dot_dimension_numbers<[1], [0], [0], [1], [0, 0, 1, 1], [], []>} : vector<2x32xf32>, vector<32x160xf32>, vector<2x160xf32> -> vector<2x160xf32>
    %51 = vector.extract_strided_slice %50 {offsets = [0, 128], sizes = [2, 32], strides = [1, 1]} : vector<2x160xf32> to vector<2x32xf32>
    %c0_18 = arith.constant 0 : index
    %c0_19 = arith.constant 0 : index
    %c0_20 = arith.constant 0 : index
    %52 = vector.load %arg3[%c0_18, %c0_19, %c0_20] : memref<2x6x32xf32, #tpu.memory_space<vmem>>, vector<2x1x32xf32>
    %53 = vector.shape_cast %52 : vector<2x1x32xf32> to vector<2x32xf32>
    %54 = vector.shape_cast %51 : vector<2x32xf32> to vector<2x1x32xf32>
    tpu.vector_store %arg3[%c0_18, %c0_19, %c0_20], %54 {strides = array<i32>} : memref<2x6x32xf32, #tpu.memory_space<vmem>>, vector<2x1x32xf32>,
    %55 = vector.extract_strided_slice %28 {offsets = [0, 1, 0], sizes = [2, 1, 128], strides = [1, 1, 1]} : vector<2x6x128xf32> to vector<2x1x128xf32>
    %56 = vector.shape_cast %55 : vector<2x1x128xf32> to vector<2x128xf32>
    %57 = vector.extract_strided_slice %50 {offsets = [0, 0], sizes = [2, 128], strides = [1, 1]} : vector<2x160xf32> to vector<2x128xf32>
    %58 = arith.addf %56, %57 : vector<2x128xf32>
    %59 = arith.negf %58 : vector<2x128xf32>
    %60 = math.exp %59 : vector<2x128xf32>
    %cst_21 = arith.constant 1.000000e+00 : f32
    %61 = vector.broadcast %cst_21 : f32 to vector<2x128xf32>
    %62 = arith.addf %61, %60 : vector<2x128xf32>
    %63 = arith.divf %61, %62 : vector<2x128xf32>
    %64 = math.tanh %58 : vector<2x128xf32>
    %65 = vector.extract_strided_slice %63 {offsets = [0, 0], sizes = [2, 32], strides = [1, 1]} : vector<2x128xf32> to vector<2x32xf32>
    %66 = vector.extract_strided_slice %63 {offsets = [0, 32], sizes = [2, 32], strides = [1, 1]} : vector<2x128xf32> to vector<2x32xf32>
    %67 = vector.extract_strided_slice %64 {offsets = [0, 64], sizes = [2, 32], strides = [1, 1]} : vector<2x128xf32> to vector<2x32xf32>
    %68 = vector.extract_strided_slice %63 {offsets = [0, 96], sizes = [2, 32], strides = [1, 1]} : vector<2x128xf32> to vector<2x32xf32>
    %69 = arith.mulf %66, %47 : vector<2x32xf32>
    %70 = arith.mulf %65, %67 : vector<2x32xf32>
    %71 = arith.addf %69, %70 : vector<2x32xf32>
    %72 = math.tanh %71 : vector<2x32xf32>
    %73 = arith.mulf %68, %72 : vector<2x32xf32>
    %cst_22 = arith.constant dense<0.000000e+00> : vector<2x160xf32>
    %74 = tpu.matmul %73, %29, %cst_22 {dimension_numbers = #tpu.dot_dimension_numbers<[1], [0], [0], [1], [0, 0, 1, 1], [], []>} : vector<2x32xf32>, vector<32x160xf32>, vector<2x160xf32> -> vector<2x160xf32>
    %75 = vector.extract_strided_slice %74 {offsets = [0, 128], sizes = [2, 32], strides = [1, 1]} : vector<2x160xf32> to vector<2x32xf32>
    %c0_23 = arith.constant 0 : index
    %c1 = arith.constant 1 : index
    %c0_24 = arith.constant 0 : index
    %76 = vector.load %arg3[%c0_23, %c1, %c0_24] : memref<2x6x32xf32, #tpu.memory_space<vmem>>, vector<2x1x32xf32>
    %77 = vector.shape_cast %76 : vector<2x1x32xf32> to vector<2x32xf32>
    %78 = vector.shape_cast %75 : vector<2x32xf32> to vector<2x1x32xf32>
    tpu.vector_store %arg3[%c0_23, %c1, %c0_24], %78 {strides = array<i32>} : memref<2x6x32xf32, #tpu.memory_space<vmem>>, vector<2x1x32xf32>,
    %79 = vector.extract_strided_slice %28 {offsets = [0, 2, 0], sizes = [2, 1, 128], strides = [1, 1, 1]} : vector<2x6x128xf32> to vector<2x1x128xf32>
    %80 = vector.shape_cast %79 : vector<2x1x128xf32> to vector<2x128xf32>
    %81 = vector.extract_strided_slice %74 {offsets = [0, 0], sizes = [2, 128], strides = [1, 1]} : vector<2x160xf32> to vector<2x128xf32>
    %82 = arith.addf %80, %81 : vector<2x128xf32>
    %83 = arith.negf %82 : vector<2x128xf32>
    %84 = math.exp %83 : vector<2x128xf32>
    %cst_25 = arith.constant 1.000000e+00 : f32
    %85 = vector.broadcast %cst_25 : f32 to vector<2x128xf32>
    %86 = arith.addf %85, %84 : vector<2x128xf32>
    %87 = arith.divf %85, %86 : vector<2x128xf32>
    %88 = math.tanh %82 : vector<2x128xf32>
    %89 = vector.extract_strided_slice %87 {offsets = [0, 0], sizes = [2, 32], strides = [1, 1]} : vector<2x128xf32> to vector<2x32xf32>
    %90 = vector.extract_strided_slice %87 {offsets = [0, 32], sizes = [2, 32], strides = [1, 1]} : vector<2x128xf32> to vector<2x32xf32>
    %91 = vector.extract_strided_slice %88 {offsets = [0, 64], sizes = [2, 32], strides = [1, 1]} : vector<2x128xf32> to vector<2x32xf32>
    %92 = vector.extract_strided_slice %87 {offsets = [0, 96], sizes = [2, 32], strides = [1, 1]} : vector<2x128xf32> to vector<2x32xf32>
    %93 = arith.mulf %90, %71 : vector<2x32xf32>
    %94 = arith.mulf %89, %91 : vector<2x32xf32>
    %95 = arith.addf %93, %94 : vector<2x32xf32>
    %96 = math.tanh %95 : vector<2x32xf32>
    %97 = arith.mulf %92, %96 : vector<2x32xf32>
    %cst_26 = arith.constant dense<0.000000e+00> : vector<2x160xf32>
    %98 = tpu.matmul %97, %29, %cst_26 {dimension_numbers = #tpu.dot_dimension_numbers<[1], [0], [0], [1], [0, 0, 1, 1], [], []>} : vector<2x32xf32>, vector<32x160xf32>, vector<2x160xf32> -> vector<2x160xf32>
    %99 = vector.extract_strided_slice %98 {offsets = [0, 128], sizes = [2, 32], strides = [1, 1]} : vector<2x160xf32> to vector<2x32xf32>
    %c0_27 = arith.constant 0 : index
    %c2 = arith.constant 2 : index
    %c0_28 = arith.constant 0 : index
    %100 = vector.load %arg3[%c0_27, %c2, %c0_28] : memref<2x6x32xf32, #tpu.memory_space<vmem>>, vector<2x1x32xf32>
    %101 = vector.shape_cast %100 : vector<2x1x32xf32> to vector<2x32xf32>
    %102 = vector.shape_cast %99 : vector<2x32xf32> to vector<2x1x32xf32>
    tpu.vector_store %arg3[%c0_27, %c2, %c0_28], %102 {strides = array<i32>} : memref<2x6x32xf32, #tpu.memory_space<vmem>>, vector<2x1x32xf32>,
    %103 = vector.extract_strided_slice %28 {offsets = [0, 3, 0], sizes = [2, 1, 128], strides = [1, 1, 1]} : vector<2x6x128xf32> to vector<2x1x128xf32>
    %104 = vector.shape_cast %103 : vector<2x1x128xf32> to vector<2x128xf32>
    %105 = vector.extract_strided_slice %98 {offsets = [0, 0], sizes = [2, 128], strides = [1, 1]} : vector<2x160xf32> to vector<2x128xf32>
    %106 = arith.addf %104, %105 : vector<2x128xf32>
    %107 = arith.negf %106 : vector<2x128xf32>
    %108 = math.exp %107 : vector<2x128xf32>
    %cst_29 = arith.constant 1.000000e+00 : f32
    %109 = vector.broadcast %cst_29 : f32 to vector<2x128xf32>
    %110 = arith.addf %109, %108 : vector<2x128xf32>
    %111 = arith.divf %109, %110 : vector<2x128xf32>
    %112 = math.tanh %106 : vector<2x128xf32>
    %113 = vector.extract_strided_slice %111 {offsets = [0, 0], sizes = [2, 32], strides = [1, 1]} : vector<2x128xf32> to vector<2x32xf32>
    %114 = vector.extract_strided_slice %111 {offsets = [0, 32], sizes = [2, 32], strides = [1, 1]} : vector<2x128xf32> to vector<2x32xf32>
    %115 = vector.extract_strided_slice %112 {offsets = [0, 64], sizes = [2, 32], strides = [1, 1]} : vector<2x128xf32> to vector<2x32xf32>
    %116 = vector.extract_strided_slice %111 {offsets = [0, 96], sizes = [2, 32], strides = [1, 1]} : vector<2x128xf32> to vector<2x32xf32>
    %117 = arith.mulf %114, %95 : vector<2x32xf32>
    %118 = arith.mulf %113, %115 : vector<2x32xf32>
    %119 = arith.addf %117, %118 : vector<2x32xf32>
    %120 = math.tanh %119 : vector<2x32xf32>
    %121 = arith.mulf %116, %120 : vector<2x32xf32>
    %cst_30 = arith.constant dense<0.000000e+00> : vector<2x160xf32>
    %122 = tpu.matmul %121, %29, %cst_30 {dimension_numbers = #tpu.dot_dimension_numbers<[1], [0], [0], [1], [0, 0, 1, 1], [], []>} : vector<2x32xf32>, vector<32x160xf32>, vector<2x160xf32> -> vector<2x160xf32>
    %123 = vector.extract_strided_slice %122 {offsets = [0, 128], sizes = [2, 32], strides = [1, 1]} : vector<2x160xf32> to vector<2x32xf32>
    %c0_31 = arith.constant 0 : index
    %c3 = arith.constant 3 : index
    %c0_32 = arith.constant 0 : index
    %124 = vector.load %arg3[%c0_31, %c3, %c0_32] : memref<2x6x32xf32, #tpu.memory_space<vmem>>, vector<2x1x32xf32>
    %125 = vector.shape_cast %124 : vector<2x1x32xf32> to vector<2x32xf32>
    %126 = vector.shape_cast %123 : vector<2x32xf32> to vector<2x1x32xf32>
    tpu.vector_store %arg3[%c0_31, %c3, %c0_32], %126 {strides = array<i32>} : memref<2x6x32xf32, #tpu.memory_space<vmem>>, vector<2x1x32xf32>,
    %127 = vector.extract_strided_slice %28 {offsets = [0, 4, 0], sizes = [2, 1, 128], strides = [1, 1, 1]} : vector<2x6x128xf32> to vector<2x1x128xf32>
    %128 = vector.shape_cast %127 : vector<2x1x128xf32> to vector<2x128xf32>
    %129 = vector.extract_strided_slice %122 {offsets = [0, 0], sizes = [2, 128], strides = [1, 1]} : vector<2x160xf32> to vector<2x128xf32>
    %130 = arith.addf %128, %129 : vector<2x128xf32>
    %131 = arith.negf %130 : vector<2x128xf32>
    %132 = math.exp %131 : vector<2x128xf32>
    %cst_33 = arith.constant 1.000000e+00 : f32
    %133 = vector.broadcast %cst_33 : f32 to vector<2x128xf32>
    %134 = arith.addf %133, %132 : vector<2x128xf32>
    %135 = arith.divf %133, %134 : vector<2x128xf32>
    %136 = math.tanh %130 : vector<2x128xf32>
    %137 = vector.extract_strided_slice %135 {offsets = [0, 0], sizes = [2, 32], strides = [1, 1]} : vector<2x128xf32> to vector<2x32xf32>
    %138 = vector.extract_strided_slice %135 {offsets = [0, 32], sizes = [2, 32], strides = [1, 1]} : vector<2x128xf32> to vector<2x32xf32>
    %139 = vector.extract_strided_slice %136 {offsets = [0, 64], sizes = [2, 32], strides = [1, 1]} : vector<2x128xf32> to vector<2x32xf32>
    %140 = vector.extract_strided_slice %135 {offsets = [0, 96], sizes = [2, 32], strides = [1, 1]} : vector<2x128xf32> to vector<2x32xf32>
    %141 = arith.mulf %138, %119 : vector<2x32xf32>
    %142 = arith.mulf %137, %139 : vector<2x32xf32>
    %143 = arith.addf %141, %142 : vector<2x32xf32>
    %144 = math.tanh %143 : vector<2x32xf32>
    %145 = arith.mulf %140, %144 : vector<2x32xf32>
    %cst_34 = arith.constant dense<0.000000e+00> : vector<2x160xf32>
    %146 = tpu.matmul %145, %29, %cst_34 {dimension_numbers = #tpu.dot_dimension_numbers<[1], [0], [0], [1], [0, 0, 1, 1], [], []>} : vector<2x32xf32>, vector<32x160xf32>, vector<2x160xf32> -> vector<2x160xf32>
    %147 = vector.extract_strided_slice %146 {offsets = [0, 128], sizes = [2, 32], strides = [1, 1]} : vector<2x160xf32> to vector<2x32xf32>
    %c0_35 = arith.constant 0 : index
    %c4 = arith.constant 4 : index
    %c0_36 = arith.constant 0 : index
    %148 = vector.load %arg3[%c0_35, %c4, %c0_36] : memref<2x6x32xf32, #tpu.memory_space<vmem>>, vector<2x1x32xf32>
    %149 = vector.shape_cast %148 : vector<2x1x32xf32> to vector<2x32xf32>
    %150 = vector.shape_cast %147 : vector<2x32xf32> to vector<2x1x32xf32>
    tpu.vector_store %arg3[%c0_35, %c4, %c0_36], %150 {strides = array<i32>} : memref<2x6x32xf32, #tpu.memory_space<vmem>>, vector<2x1x32xf32>,
    %151 = vector.extract_strided_slice %28 {offsets = [0, 5, 0], sizes = [2, 1, 128], strides = [1, 1, 1]} : vector<2x6x128xf32> to vector<2x1x128xf32>
    %152 = vector.shape_cast %151 : vector<2x1x128xf32> to vector<2x128xf32>
    %153 = vector.extract_strided_slice %146 {offsets = [0, 0], sizes = [2, 128], strides = [1, 1]} : vector<2x160xf32> to vector<2x128xf32>
    %154 = arith.addf %152, %153 : vector<2x128xf32>
    %155 = arith.negf %154 : vector<2x128xf32>
    %156 = math.exp %155 : vector<2x128xf32>
    %cst_37 = arith.constant 1.000000e+00 : f32
    %157 = vector.broadcast %cst_37 : f32 to vector<2x128xf32>
    %158 = arith.addf %157, %156 : vector<2x128xf32>
    %159 = arith.divf %157, %158 : vector<2x128xf32>
    %160 = math.tanh %154 : vector<2x128xf32>
    %161 = vector.extract_strided_slice %159 {offsets = [0, 0], sizes = [2, 32], strides = [1, 1]} : vector<2x128xf32> to vector<2x32xf32>
    %162 = vector.extract_strided_slice %159 {offsets = [0, 32], sizes = [2, 32], strides = [1, 1]} : vector<2x128xf32> to vector<2x32xf32>
    %163 = vector.extract_strided_slice %160 {offsets = [0, 64], sizes = [2, 32], strides = [1, 1]} : vector<2x128xf32> to vector<2x32xf32>
    %164 = vector.extract_strided_slice %159 {offsets = [0, 96], sizes = [2, 32], strides = [1, 1]} : vector<2x128xf32> to vector<2x32xf32>
    %165 = arith.mulf %162, %143 : vector<2x32xf32>
    %166 = arith.mulf %161, %163 : vector<2x32xf32>
    %167 = arith.addf %165, %166 : vector<2x32xf32>
    %168 = math.tanh %167 : vector<2x32xf32>
    %169 = arith.mulf %164, %168 : vector<2x32xf32>
    %170 = vector.extract_strided_slice %29 {offsets = [0, 128], sizes = [32, 32], strides = [1, 1]} : vector<32x160xf32> to vector<32x32xf32>
    %cst_38 = arith.constant dense<0.000000e+00> : vector<2x32xf32>
    %171 = tpu.matmul %169, %170, %cst_38 {dimension_numbers = #tpu.dot_dimension_numbers<[1], [0], [0], [1], [0, 0, 1, 1], [], []>} : vector<2x32xf32>, vector<32x32xf32>, vector<2x32xf32> -> vector<2x32xf32>
    %c0_39 = arith.constant 0 : index
    %c5 = arith.constant 5 : index
    %c0_40 = arith.constant 0 : index
    %172 = vector.load %arg3[%c0_39, %c5, %c0_40] : memref<2x6x32xf32, #tpu.memory_space<vmem>>, vector<2x1x32xf32>
    %173 = vector.shape_cast %172 : vector<2x1x32xf32> to vector<2x32xf32>
    %174 = vector.shape_cast %171 : vector<2x32xf32> to vector<2x1x32xf32>
    tpu.vector_store %arg3[%c0_39, %c5, %c0_40], %174 {strides = array<i32>} : memref<2x6x32xf32, #tpu.memory_space<vmem>>, vector<2x1x32xf32>,
    %c0_41 = arith.constant 0 : index
    %c0_42 = arith.constant 0 : index
    %c0_43 = arith.constant 0 : index
    %175 = vector.load %arg3[%c0_41, %c0_42, %c0_43] : memref<2x6x32xf32, #tpu.memory_space<vmem>>, vector<2x6x32xf32>
    %c120 = arith.constant 120 : index
    %c0_44 = arith.constant 0 : index
    %176 = vector.load %arg1[%c120, %c0_44] : memref<216x160xf32, #tpu.memory_space<vmem>>, vector<40x128xf32>
    %c168 = arith.constant 168 : index
    %c0_45 = arith.constant 0 : index
    %177 = vector.load %arg1[%c168, %c0_45] : memref<216x160xf32, #tpu.memory_space<vmem>>, vector<32x32xf32>
    %c160 = arith.constant 160 : index
    %c0_46 = arith.constant 0 : index
    %178 = vector.load %arg1[%c160, %c0_46] : memref<216x160xf32, #tpu.memory_space<vmem>>, vector<1x128xf32>
    %179 = vector.shape_cast %178 : vector<1x128xf32> to vector<1x128xf32>
    %180 = vector.broadcast %179 : vector<1x128xf32> to vector<2x128xf32>
    %c200 = arith.constant 200 : index
    %c0_47 = arith.constant 0 : index
    %181 = vector.load %arg1[%c200, %c0_47] : memref<216x160xf32, #tpu.memory_space<vmem>>, vector<1x32xf32>
    %182 = vector.shape_cast %181 : vector<1x32xf32> to vector<1x1x32xf32>
    %183 = vector.shape_cast %182 : vector<1x1x32xf32> to vector<1x1x32xf32>
    %184 = vector.broadcast %183 : vector<1x1x32xf32> to vector<2x6x32xf32>
    %185 = tpu.iota {dimensions = array<i32: 1>} : vector<2x6xi32>
    %c208 = arith.constant 208 : index
    %c0_48 = arith.constant 0 : index
    %186 = vector.load %arg1[%c208, %c0_48] : memref<216x160xf32, #tpu.memory_space<vmem>>, vector<1x8xf32>
    %187 = vector.shape_cast %186 : vector<1x8xf32> to vector<1x8xf32>
    %188 = vector.broadcast %187 : vector<1x8xf32> to vector<2x8xf32>
    %189 = tpu.concatenate %188, %169 in 1 : vector<2x8xf32>, vector<2x32xf32> -> vector<2x40xf32>
    %cst_49 = arith.constant dense<0.000000e+00> : vector<2x128xf32>
    %190 = tpu.matmul %189, %176, %cst_49 {dimension_numbers = #tpu.dot_dimension_numbers<[1], [0], [0], [1], [0, 0, 1, 1], [], []>} : vector<2x40xf32>, vector<40x128xf32>, vector<2x128xf32> -> vector<2x128xf32>
    %191 = arith.addf %190, %180 : vector<2x128xf32>
    %192 = arith.negf %191 : vector<2x128xf32>
    %193 = math.exp %192 : vector<2x128xf32>
    %cst_50 = arith.constant 1.000000e+00 : f32
    %194 = vector.broadcast %cst_50 : f32 to vector<2x128xf32>
    %195 = arith.addf %194, %193 : vector<2x128xf32>
    %196 = arith.divf %194, %195 : vector<2x128xf32>
    %197 = math.tanh %191 : vector<2x128xf32>
    %198 = vector.extract_strided_slice %196 {offsets = [0, 0], sizes = [2, 32], strides = [1, 1]} : vector<2x128xf32> to vector<2x32xf32>
    %199 = vector.extract_strided_slice %196 {offsets = [0, 32], sizes = [2, 32], strides = [1, 1]} : vector<2x128xf32> to vector<2x32xf32>
    %200 = vector.extract_strided_slice %197 {offsets = [0, 64], sizes = [2, 32], strides = [1, 1]} : vector<2x128xf32> to vector<2x32xf32>
    %201 = vector.extract_strided_slice %196 {offsets = [0, 96], sizes = [2, 32], strides = [1, 1]} : vector<2x128xf32> to vector<2x32xf32>
    %202 = arith.mulf %199, %167 : vector<2x32xf32>
    %203 = arith.mulf %198, %200 : vector<2x32xf32>
    %204 = arith.addf %202, %203 : vector<2x32xf32>
    %205 = math.tanh %204 : vector<2x32xf32>
    %206 = arith.mulf %201, %205 : vector<2x32xf32>
    %cst_51 = arith.constant dense<0.000000e+00> : vector<2x32xf32>
    %207 = tpu.matmul %206, %177, %cst_51 {dimension_numbers = #tpu.dot_dimension_numbers<[1], [0], [0], [1], [0, 0, 1, 1], [], []>} : vector<2x32xf32>, vector<32x32xf32>, vector<2x32xf32> -> vector<2x32xf32>
    %208 = vector.shape_cast %207 : vector<2x32xf32> to vector<2x1x32xf32>
    %209 = vector.broadcast %208 : vector<2x1x32xf32> to vector<2x6x32xf32>
    %210 = arith.addf %175, %209 : vector<2x6x32xf32>
    %211 = math.tanh %210 : vector<2x6x32xf32>
    %212 = arith.mulf %211, %184 : vector<2x6x32xf32>
    %cst_52 = arith.constant dense<0.000000e+00> : vector<2x6xf32>
    %213 = vector.multi_reduction <add>, %212, %cst_52 [2] : vector<2x6x32xf32> to vector<2x6xf32>
    %c0_53 = arith.constant 0 : index
    %c0_54 = arith.constant 0 : index
    %c0_55 = arith.constant 0 : index
    %214 = vector.load %arg2[%c0_53, %c0_54, %c0_55] : memref<4x2x6xf32, #tpu.memory_space<vmem>>, vector<1x2x6xf32>
    %215 = vector.shape_cast %214 : vector<1x2x6xf32> to vector<2x6xf32>
    %216 = vector.shape_cast %213 : vector<2x6xf32> to vector<1x2x6xf32>
    tpu.vector_store %arg2[%c0_53, %c0_54, %c0_55], %216 {strides = array<i32>} : memref<4x2x6xf32, #tpu.memory_space<vmem>>, vector<1x2x6xf32>,
    %cst_56 = arith.constant dense<0xFF800000> : vector<2xf32>
    %217 = vector.multi_reduction <maximumf>, %213, %cst_56 [1] : vector<2x6xf32> to vector<2xf32>
    %218 = vector.shape_cast %217 : vector<2xf32> to vector<2x1xf32>
    %219 = vector.broadcast %218 : vector<2x1xf32> to vector<2x6xf32>
    %220 = arith.cmpf oeq, %213, %219 : vector<2x6xf32>
    %c6_i32 = arith.constant 6 : i32
    %221 = vector.broadcast %c6_i32 : i32 to vector<2x6xi32>
    %222 = arith.select %220, %185, %221 : vector<2x6xi1>, vector<2x6xi32>
    %cst_57 = arith.constant dense<2147483647> : vector<2xi32>
    %223 = vector.multi_reduction <minsi>, %222, %cst_57 [1] : vector<2x6xi32> to vector<2xi32>
    %224 = vector.shape_cast %223 : vector<2xi32> to vector<2x1xi32>
    %225 = vector.broadcast %224 : vector<2x1xi32> to vector<2x6xi32>
    %226 = arith.cmpi eq, %185, %225 : vector<2x6xi32>
    %227 = arith.extui %226 : vector<2x6xi1> to vector<2x6xi32>
    %228 = arith.sitofp %227 : vector<2x6xi32> to vector<2x6xf32>
    %229 = vector.shape_cast %228 : vector<2x6xf32> to vector<2x6x1xf32>
    %230 = vector.broadcast %229 : vector<2x6x1xf32> to vector<2x6x8xf32>
    %231 = arith.mulf %230, %21 : vector<2x6x8xf32>
    %cst_58 = arith.constant dense<0.000000e+00> : vector<2x8xf32>
    %232 = vector.multi_reduction <add>, %231, %cst_58 [1] : vector<2x6x8xf32> to vector<2x8xf32>
    %233 = tpu.concatenate %232, %206 in 1 : vector<2x8xf32>, vector<2x32xf32> -> vector<2x40xf32>
    %cst_59 = arith.constant dense<0.000000e+00> : vector<2x128xf32>
    %234 = tpu.matmul %233, %176, %cst_59 {dimension_numbers = #tpu.dot_dimension_numbers<[1], [0], [0], [1], [0, 0, 1, 1], [], []>} : vector<2x40xf32>, vector<40x128xf32>, vector<2x128xf32> -> vector<2x128xf32>
    %235 = arith.addf %234, %180 : vector<2x128xf32>
    %236 = arith.negf %235 : vector<2x128xf32>
    %237 = math.exp %236 : vector<2x128xf32>
    %cst_60 = arith.constant 1.000000e+00 : f32
    %238 = vector.broadcast %cst_60 : f32 to vector<2x128xf32>
    %239 = arith.addf %238, %237 : vector<2x128xf32>
    %240 = arith.divf %238, %239 : vector<2x128xf32>
    %241 = math.tanh %235 : vector<2x128xf32>
    %242 = vector.extract_strided_slice %240 {offsets = [0, 0], sizes = [2, 32], strides = [1, 1]} : vector<2x128xf32> to vector<2x32xf32>
    %243 = vector.extract_strided_slice %240 {offsets = [0, 32], sizes = [2, 32], strides = [1, 1]} : vector<2x128xf32> to vector<2x32xf32>
    %244 = vector.extract_strided_slice %241 {offsets = [0, 64], sizes = [2, 32], strides = [1, 1]} : vector<2x128xf32> to vector<2x32xf32>
    %245 = vector.extract_strided_slice %240 {offsets = [0, 96], sizes = [2, 32], strides = [1, 1]} : vector<2x128xf32> to vector<2x32xf32>
    %246 = arith.mulf %243, %204 : vector<2x32xf32>
    %247 = arith.mulf %242, %244 : vector<2x32xf32>
    %248 = arith.addf %246, %247 : vector<2x32xf32>
    %249 = math.tanh %248 : vector<2x32xf32>
    %250 = arith.mulf %245, %249 : vector<2x32xf32>
    %cst_61 = arith.constant dense<0.000000e+00> : vector<2x32xf32>
    %251 = tpu.matmul %250, %177, %cst_61 {dimension_numbers = #tpu.dot_dimension_numbers<[1], [0], [0], [1], [0, 0, 1, 1], [], []>} : vector<2x32xf32>, vector<32x32xf32>, vector<2x32xf32> -> vector<2x32xf32>
    %252 = vector.shape_cast %251 : vector<2x32xf32> to vector<2x1x32xf32>
    %253 = vector.broadcast %252 : vector<2x1x32xf32> to vector<2x6x32xf32>
    %254 = arith.addf %175, %253 : vector<2x6x32xf32>
    %255 = math.tanh %254 : vector<2x6x32xf32>
    %256 = arith.mulf %255, %184 : vector<2x6x32xf32>
    %cst_62 = arith.constant dense<0.000000e+00> : vector<2x6xf32>
    %257 = vector.multi_reduction <add>, %256, %cst_62 [2] : vector<2x6x32xf32> to vector<2x6xf32>
    %c1_63 = arith.constant 1 : index
    %c0_64 = arith.constant 0 : index
    %c0_65 = arith.constant 0 : index
    %258 = vector.load %arg2[%c1_63, %c0_64, %c0_65] : memref<4x2x6xf32, #tpu.memory_space<vmem>>, vector<1x2x6xf32>
    %259 = vector.shape_cast %258 : vector<1x2x6xf32> to vector<2x6xf32>
    %260 = vector.shape_cast %257 : vector<2x6xf32> to vector<1x2x6xf32>
    tpu.vector_store %arg2[%c1_63, %c0_64, %c0_65], %260 {strides = array<i32>} : memref<4x2x6xf32, #tpu.memory_space<vmem>>, vector<1x2x6xf32>,
    %cst_66 = arith.constant dense<0xFF800000> : vector<2xf32>
    %261 = vector.multi_reduction <maximumf>, %257, %cst_66 [1] : vector<2x6xf32> to vector<2xf32>
    %262 = vector.shape_cast %261 : vector<2xf32> to vector<2x1xf32>
    %263 = vector.broadcast %262 : vector<2x1xf32> to vector<2x6xf32>
    %264 = arith.cmpf oeq, %257, %263 : vector<2x6xf32>
    %c6_i32_67 = arith.constant 6 : i32
    %265 = vector.broadcast %c6_i32_67 : i32 to vector<2x6xi32>
    %266 = arith.select %264, %185, %265 : vector<2x6xi1>, vector<2x6xi32>
    %cst_68 = arith.constant dense<2147483647> : vector<2xi32>
    %267 = vector.multi_reduction <minsi>, %266, %cst_68 [1] : vector<2x6xi32> to vector<2xi32>
    %268 = vector.shape_cast %267 : vector<2xi32> to vector<2x1xi32>
    %269 = vector.broadcast %268 : vector<2x1xi32> to vector<2x6xi32>
    %270 = arith.cmpi eq, %185, %269 : vector<2x6xi32>
    %271 = arith.extui %270 : vector<2x6xi1> to vector<2x6xi32>
    %272 = arith.sitofp %271 : vector<2x6xi32> to vector<2x6xf32>
    %273 = vector.shape_cast %272 : vector<2x6xf32> to vector<2x6x1xf32>
    %274 = vector.broadcast %273 : vector<2x6x1xf32> to vector<2x6x8xf32>
    %275 = arith.mulf %274, %21 : vector<2x6x8xf32>
    %cst_69 = arith.constant dense<0.000000e+00> : vector<2x8xf32>
    %276 = vector.multi_reduction <add>, %275, %cst_69 [1] : vector<2x6x8xf32> to vector<2x8xf32>
    %277 = tpu.concatenate %276, %250 in 1 : vector<2x8xf32>, vector<2x32xf32> -> vector<2x40xf32>
    %cst_70 = arith.constant dense<0.000000e+00> : vector<2x128xf32>
    %278 = tpu.matmul %277, %176, %cst_70 {dimension_numbers = #tpu.dot_dimension_numbers<[1], [0], [0], [1], [0, 0, 1, 1], [], []>} : vector<2x40xf32>, vector<40x128xf32>, vector<2x128xf32> -> vector<2x128xf32>
    %279 = arith.addf %278, %180 : vector<2x128xf32>
    %280 = arith.negf %279 : vector<2x128xf32>
    %281 = math.exp %280 : vector<2x128xf32>
    %cst_71 = arith.constant 1.000000e+00 : f32
    %282 = vector.broadcast %cst_71 : f32 to vector<2x128xf32>
    %283 = arith.addf %282, %281 : vector<2x128xf32>
    %284 = arith.divf %282, %283 : vector<2x128xf32>
    %285 = math.tanh %279 : vector<2x128xf32>
    %286 = vector.extract_strided_slice %284 {offsets = [0, 0], sizes = [2, 32], strides = [1, 1]} : vector<2x128xf32> to vector<2x32xf32>
    %287 = vector.extract_strided_slice %284 {offsets = [0, 32], sizes = [2, 32], strides = [1, 1]} : vector<2x128xf32> to vector<2x32xf32>
    %288 = vector.extract_strided_slice %285 {offsets = [0, 64], sizes = [2, 32], strides = [1, 1]} : vector<2x128xf32> to vector<2x32xf32>
    %289 = vector.extract_strided_slice %284 {offsets = [0, 96], sizes = [2, 32], strides = [1, 1]} : vector<2x128xf32> to vector<2x32xf32>
    %290 = arith.mulf %287, %248 : vector<2x32xf32>
    %291 = arith.mulf %286, %288 : vector<2x32xf32>
    %292 = arith.addf %290, %291 : vector<2x32xf32>
    %293 = math.tanh %292 : vector<2x32xf32>
    %294 = arith.mulf %289, %293 : vector<2x32xf32>
    %cst_72 = arith.constant dense<0.000000e+00> : vector<2x32xf32>
    %295 = tpu.matmul %294, %177, %cst_72 {dimension_numbers = #tpu.dot_dimension_numbers<[1], [0], [0], [1], [0, 0, 1, 1], [], []>} : vector<2x32xf32>, vector<32x32xf32>, vector<2x32xf32> -> vector<2x32xf32>
    %296 = vector.shape_cast %295 : vector<2x32xf32> to vector<2x1x32xf32>
    %297 = vector.broadcast %296 : vector<2x1x32xf32> to vector<2x6x32xf32>
    %298 = arith.addf %175, %297 : vector<2x6x32xf32>
    %299 = math.tanh %298 : vector<2x6x32xf32>
    %300 = arith.mulf %299, %184 : vector<2x6x32xf32>
    %cst_73 = arith.constant dense<0.000000e+00> : vector<2x6xf32>
    %301 = vector.multi_reduction <add>, %300, %cst_73 [2] : vector<2x6x32xf32> to vector<2x6xf32>
    %c2_74 = arith.constant 2 : index
    %c0_75 = arith.constant 0 : index
    %c0_76 = arith.constant 0 : index
    %302 = vector.load %arg2[%c2_74, %c0_75, %c0_76] : memref<4x2x6xf32, #tpu.memory_space<vmem>>, vector<1x2x6xf32>
    %303 = vector.shape_cast %302 : vector<1x2x6xf32> to vector<2x6xf32>
    %304 = vector.shape_cast %301 : vector<2x6xf32> to vector<1x2x6xf32>
    tpu.vector_store %arg2[%c2_74, %c0_75, %c0_76], %304 {strides = array<i32>} : memref<4x2x6xf32, #tpu.memory_space<vmem>>, vector<1x2x6xf32>,
    %cst_77 = arith.constant dense<0xFF800000> : vector<2xf32>
    %305 = vector.multi_reduction <maximumf>, %301, %cst_77 [1] : vector<2x6xf32> to vector<2xf32>
    %306 = vector.shape_cast %305 : vector<2xf32> to vector<2x1xf32>
    %307 = vector.broadcast %306 : vector<2x1xf32> to vector<2x6xf32>
    %308 = arith.cmpf oeq, %301, %307 : vector<2x6xf32>
    %c6_i32_78 = arith.constant 6 : i32
    %309 = vector.broadcast %c6_i32_78 : i32 to vector<2x6xi32>
    %310 = arith.select %308, %185, %309 : vector<2x6xi1>, vector<2x6xi32>
    %cst_79 = arith.constant dense<2147483647> : vector<2xi32>
    %311 = vector.multi_reduction <minsi>, %310, %cst_79 [1] : vector<2x6xi32> to vector<2xi32>
    %312 = vector.shape_cast %311 : vector<2xi32> to vector<2x1xi32>
    %313 = vector.broadcast %312 : vector<2x1xi32> to vector<2x6xi32>
    %314 = arith.cmpi eq, %185, %313 : vector<2x6xi32>
    %315 = arith.extui %314 : vector<2x6xi1> to vector<2x6xi32>
    %316 = arith.sitofp %315 : vector<2x6xi32> to vector<2x6xf32>
    %317 = vector.shape_cast %316 : vector<2x6xf32> to vector<2x6x1xf32>
    %318 = vector.broadcast %317 : vector<2x6x1xf32> to vector<2x6x8xf32>
    %319 = arith.mulf %318, %21 : vector<2x6x8xf32>
    %cst_80 = arith.constant dense<0.000000e+00> : vector<2x8xf32>
    %320 = vector.multi_reduction <add>, %319, %cst_80 [1] : vector<2x6x8xf32> to vector<2x8xf32>
    %321 = tpu.concatenate %320, %294 in 1 : vector<2x8xf32>, vector<2x32xf32> -> vector<2x40xf32>
    %cst_81 = arith.constant dense<0.000000e+00> : vector<2x128xf32>
    %322 = tpu.matmul %321, %176, %cst_81 {dimension_numbers = #tpu.dot_dimension_numbers<[1], [0], [0], [1], [0, 0, 1, 1], [], []>} : vector<2x40xf32>, vector<40x128xf32>, vector<2x128xf32> -> vector<2x128xf32>
    %323 = arith.addf %322, %180 : vector<2x128xf32>
    %324 = arith.negf %323 : vector<2x128xf32>
    %325 = math.exp %324 : vector<2x128xf32>
    %cst_82 = arith.constant 1.000000e+00 : f32
    %326 = vector.broadcast %cst_82 : f32 to vector<2x128xf32>
    %327 = arith.addf %326, %325 : vector<2x128xf32>
    %328 = arith.divf %326, %327 : vector<2x128xf32>
    %329 = math.tanh %323 : vector<2x128xf32>
    %330 = vector.extract_strided_slice %328 {offsets = [0, 0], sizes = [2, 32], strides = [1, 1]} : vector<2x128xf32> to vector<2x32xf32>
    %331 = vector.extract_strided_slice %328 {offsets = [0, 32], sizes = [2, 32], strides = [1, 1]} : vector<2x128xf32> to vector<2x32xf32>
    %332 = vector.extract_strided_slice %329 {offsets = [0, 64], sizes = [2, 32], strides = [1, 1]} : vector<2x128xf32> to vector<2x32xf32>
    %333 = vector.extract_strided_slice %328 {offsets = [0, 96], sizes = [2, 32], strides = [1, 1]} : vector<2x128xf32> to vector<2x32xf32>
    %334 = arith.mulf %331, %292 : vector<2x32xf32>
    %335 = arith.mulf %330, %332 : vector<2x32xf32>
    %336 = arith.addf %334, %335 : vector<2x32xf32>
    %337 = math.tanh %336 : vector<2x32xf32>
    %338 = arith.mulf %333, %337 : vector<2x32xf32>
    %cst_83 = arith.constant dense<0.000000e+00> : vector<2x32xf32>
    %339 = tpu.matmul %338, %177, %cst_83 {dimension_numbers = #tpu.dot_dimension_numbers<[1], [0], [0], [1], [0, 0, 1, 1], [], []>} : vector<2x32xf32>, vector<32x32xf32>, vector<2x32xf32> -> vector<2x32xf32>
    %340 = vector.shape_cast %339 : vector<2x32xf32> to vector<2x1x32xf32>
    %341 = vector.broadcast %340 : vector<2x1x32xf32> to vector<2x6x32xf32>
    %342 = arith.addf %175, %341 : vector<2x6x32xf32>
    %343 = math.tanh %342 : vector<2x6x32xf32>
    %344 = arith.mulf %343, %184 : vector<2x6x32xf32>
    %cst_84 = arith.constant dense<0.000000e+00> : vector<2x6xf32>
    %345 = vector.multi_reduction <add>, %344, %cst_84 [2] : vector<2x6x32xf32> to vector<2x6xf32>
    %c3_85 = arith.constant 3 : index
    %c0_86 = arith.constant 0 : index
    %c0_87 = arith.constant 0 : index
    %346 = vector.load %arg2[%c3_85, %c0_86, %c0_87] : memref<4x2x6xf32, #tpu.memory_space<vmem>>, vector<1x2x6xf32>
    %347 = vector.shape_cast %346 : vector<1x2x6xf32> to vector<2x6xf32>
    %348 = vector.shape_cast %345 : vector<2x6xf32> to vector<1x2x6xf32>
    tpu.vector_store %arg2[%c3_85, %c0_86, %c0_87], %348 {strides = array<i32>} : memref<4x2x6xf32, #tpu.memory_space<vmem>>, vector<1x2x6xf32>,
    return
  }
}

</mosaic_0001>

<bundles_post_ra>
// kernel: tpu_custom_call.1
= control target key start
LH: loop header
LB: loop body
LE: loop exit
PB: predicated region body
PF: predicated region fallthrough
CT: control target
= control target key end

     0   :  { %v18_v2 = vlaneseq  ;;  %v3195_v3 = vmov 1934713408   ;;  %v3196_v5 = vmov 0.0   ;;  %s3930_s0 = inlined_call_operand.vmem [shape: f32[2,8,8], index: 0, kind: input, shape index: {}]   ;;  %s3931_s1 = inlined_call_operand.vmem [shape: f32[216,160], index: 1, kind: input, shape index: {}]   ;;  %s3932_s2 = inlined_call_operand.hbm [shape: f32[4,2,6], index: 2, kind: output, shape index: {}]  }
   0x1   :  { %v12_v0 = vld [vmem:[%s3930_s0] sm:$0xff]  ;;  %v13_v1 = vld [vmem:[%s3930_s0 + $0x8] sm:$0xff]  ;;  %v16_v4 = vunpack.c.l.s4 %v3195_v3  ;;  %2878 = vmatprep.subr.mxu0 %v3196_v5  ;;  %v30_v6 = vld [vmem:[%s3931_s1 + $0x10] sm:$0xff]  ;;  %2885 = vmatprep.subr.mxu1 %v3196_v5 }
   0x2   :  { %v29_v7 = vld [vmem:[%s3931_s1] sm:$0xff]  ;;  %v106_v8 = vld [vmem:[%s3931_s1 + $0x30] ss:$0 sm:$0xff]  ;;  %v3240_v9 = vshrl.u32 %v18_v2, 7  ;;  %2879 = vmatpush3.msra.mxu0 %v30_v6  ;;  %v14_v11 = vcombine.low %v12_v0, %v13_v1 }
   0x3   :  { %3008 = vpush %v106_v8  ;;  %v115_v10 = vld [vmem:[%s3931_s1 + $0x70] sm:$0xff]  ;;  %v17_v12 = vunpack.c.0.s8 %v16_v4  ;;  %2880 = vmatprep.subr.mxu0 %v3196_v5 }
   0x4   :  { %2886 = vmatpush3.msra.mxu1 %v115_v10 }
   0x5   :  { %7 = vsyncpa [#allocation4], 0  ;;  %2881 = vmatpush3.msra.mxu0 %v29_v7  ;;  %2887 = vmatprep.subr.mxu1 %v3196_v5  ;;  %v20_v13 = vsub.s32 %v17_v12, %v3240_v9  ;;  %vm3197_vm0 = vmmov 0   ;;  %s3198_s21 = smov 8   ;;  %vm27_vm1 = vcmask 64512   ;;  %vm32_vm2 = vcmask 130048  }
   0x6   :  { %2882 = vmatprep.mubr.msk.f32.mxu0 %vm3197_vm0, %v3196_v5  ;;  %2893 = vmatprep.mubr.msk.f32.mxu1 %vm3197_vm0, %v3196_v5  ;;  %v3199_v18 = vmov 1983009808   ;;  %v210_v22 = vcombine.high %v13_v1, %v13_v1  ;;  %v114_v23 = vld [vmem:[%s3931_s1 + $0x60] sm:$0xff]  ;;  %v193_v24 = vcombine.high %v12_v0, %v12_v0  ;;  %v113_v27 = vld [vmem:[%s3931_s1 + $0x50] sm:$0xff]  ;;  %v3278_v34 = vld [vmem:[%s3931_s1 + $0xd8] sm:$0xff]  ;;  %vm117_vm4 = vcmask 261120  }
   0x7   :  { %v21_v14 = vrot.slane %v14_v11, %v20_v13  ;;  %v195_v19 = vunpack.c.l.s4 %v3199_v18  ;;  %2888 = vmatpush3.msra.mxu1 %v114_v23  ;;  %v112_v28 = vld [vmem:[%s3931_s1 + $0x40] sm:$0xff]  ;;  %v227_v29 = vld [vmem:[%s3931_s1 + $0x90] sm:$0xff]  ;;  %v3294_v43 = vld [vmem:[%s3931_s1 + $0xc8] sm:$0xff]  ;;  %s3200_s25 = smov 64   ;;  %s3201_s26 = smov 32   ;;  %vm518_vm5 = vcmask 1041409  }
   0x8   :  { %2889 = vmatprep.subr.mxu1 %v3196_v5  ;;  %2896 = vmatprep.subr.mxu0 %v227_v29  ;;  %v3288_v42 = vld [vmem:[%s3931_s1 + $0xd0] sm:$0xff]  ;;  %v3300_v44 = vld [vmem:[%s3931_s1 + $0xc0] sm:$0xff]  ;;  %v3306_v45 = vld [vmem:[%s3931_s1 + $0xb8] sm:$0xff]  ;;  %vm620_vm6 = vcmask 253952   ;;  %s3203_s9 = smov 40   ;;  %vm1546_vm7 = vcmask 326656  }
   0x9   :  { %v22_v15 = vcombine.high %v21_v14, %v3196_v5  ;;  %v196_v20 = vunpack.c.0.s8 %v195_v19  ;;  %2890 = vmatpush3.msra.mxu1 %v113_v27  ;;  %v31_v46 = vld [vmem:[%s3931_s1 + $0x20] ss:$0 sm:$0xff]  ;;  %v3324_v53 = vld [vmem:[%s3931_s1 + $0xb0] sm:$0xff]  ;;  %v3330_v54 = vld [vmem:[%s3931_s1 + $0xa8] sm:$0xff]  ;;  %vm1770_vm8 = vcmask 259072   ;;  %vm1789_vm9 = vcmask 41984  }
   0xa   :  { %2891 = vmatprep.subr.mxu1 %v3196_v5  ;;  %v3337_v55 = vld [vmem:[%s3931_s1 + $0xa0] sm:$0xff]  ;;  %vm1865_vm14 = vcmask 62464  }
   0xb   :  { %24 = vrot.lane.b32.xlu0 %v22_v15, %s3198_s21  ;;  %v3255_v21 = vsub.s32 %v196_v20, %v3240_v9  ;;  %2892 = vmatpush3.msra.mxu1 %v112_v28  ;;  %v228_v56 = vld [vmem:[%s3931_s1 + $0xe0] ss:$0 sm:$0xff] }
   0xc   :  { %548 = vmatprep.subr.mxu1 %v3278_v34  ;;  %v116_v59 = vld [vmem:[%s3931_s1 + $0x80] ss:$0 sm:$0xff] }
   0xd   :  { %v200_v25 = vrot.slane %v12_v0, %v3255_v21  ;;  %v224_v26 = vrot.slane %v210_v22, %v3255_v21  ;;  %v207_v30 = vrot.slane %v193_v24, %v3255_v21  ;;  %v217_v32 = vrot.slane %v13_v1, %v3255_v21 }
   0xf   :  { %v208_v31 = vcombine.high %v200_v25, %v200_v25  ;;  %v226_v33 = vcombine.high %v224_v26, %v224_v26  ;;  %v2777_v36 = vcombine.high %v207_v30, %v217_v32 }
  0x11   :  { %v229_v35 = vcombine.low %v208_v31, %v207_v30  ;;  %v246_v37 = vcombine.low %v224_v26, %v226_v33  ;;  %v244_v39 = vrot.slane %v2777_v36, %v3255_v21 }
  0x13   :  { %v237_v38 = vrot.slane %v229_v35, %v3255_v21  ;;  %v253_v40 = vrot.slane %v246_v37, %v3255_v21 }
  0x15   :  { %v245_v41 = vcombine.low %v237_v38, %v244_v39  ;;  %v3388_v39 = vsub.s32 0, %v3240_v9 }
  0x34   :  { %s3009_s12 = spop %3008 }
  0x35   :  { %v109_v48 = vstv %s3009_s12 }
  0x7d   :  { %v25_v16 = vpop.permute.xlu0 %24 }
  0x7e   :  { %v28_v17 = vsel %vm27_vm1, %v21_v14, %v25_v16 }
  0x7f   :  { %2883 = vmatmul.mubr.msk.f32.vlgmr.msra.gmra.mxu0 %vm32_vm2, %v28_v17 }
  0x80   :  { %2897 = vmatpush3.msra.mxu0 %v227_v29  ;;  %2898 = vmatprep.mubr.msk.f32.mxu0 %vm27_vm1, %v245_v41 }
  0x81   :  { %401 = vmatprep.subr.mxu0 %v3278_v34 }
  0x83   :  { %2899 = vmatmul.mubr.msk.f32.vlgmr.msra.gmra.mxu0 %vm27_vm1, %v253_v40 }
  0x84   :  { %402 = vmatpush1.msra.mxu0 %v3288_v42  ;;  %441 = vmatprep.mubr.f32.mxu0 %v3196_v5 }
  0x85   :  { %403 = vmatprep.subr.mxu0 %v3294_v43 }
  0x86   :  { %404 = vmatpush1.msra.mxu0 %v3300_v44 }
  0x87   :  { %405 = vmatprep.subr.mxu0 %v3306_v45 }
  0x88   :  { %406 = vmatpush1.msra.mxu0 %v3324_v53 }
  0x89   :  { %407 = vmatprep.subr.mxu0 %v3330_v54 }
  0x8a   :  { %408 = vmatpush1.msra.mxu0 %v3337_v55 }
  0x8b   :  { %729 = vmatprep.subr.mxu0 %v3278_v34 }
 0x13f   :  { %v102_v47 = vpop.f32.mrf.mxu0 }
 0x140   :  { %v103_v49 = vadd.f32 %v102_v47, %v31_v46 }
 0x141   :  { %v2884_v50 = vpop.f32.mrf.mxu0 }
 0x142   :  { %vm108_vm3 = vcmp.gt.f32.partialorder %v103_v49, 0.0  ;;  %v110_v51 = vmul.f32 %v109_v48, %v103_v49 }
 0x143   :  { %v2900_v57 = vpop.f32.mrf.mxu0 }
 0x144   :  { %v111_v52 = vsel %vm108_vm3, %v103_v49, %v110_v51  ;;  %v3347_v58 = vadd.f32 %v2900_v57, %v228_v56  ;;  %v3202_v51 = vmov 1966171168  }
 0x145   :  { %2894 = vmatmul.mubr.msk.f32.vlgmr.msra.gmra.mxu1 %vm117_vm4, %v111_v52  ;;  %v324_v63 = vpop.f32.mrf.mxu0  ;;  %v597_v52 = vunpack.c.l.s4 %v3202_v51 }
 0x146   :  { %549 = vmatpush1.msra.mxu1 %v3288_v42  ;;  %588 = vmatprep.mubr.f32.mxu1 %v3196_v5  ;;  %v325_v0 = vadd.f32 %v324_v63, %v228_v56 }
 0x147   :  { %550 = vmatprep.subr.mxu1 %v3294_v43  ;;  %v598_v56 = vunpack.c.0.s8 %v597_v52 }
 0x148   :  { %551 = vmatpush1.msra.mxu1 %v3300_v44  ;;  %v335_v1 = vcombine.high %v325_v0, %v325_v0  ;;  %v3366_v6 = vrot.slane %v325_v0, %v3255_v21 }
 0x149   :  { %552 = vmatprep.subr.mxu1 %v3306_v45  ;;  %v3405_v57 = vsub.s32 %v598_v56, %v3240_v9 }
 0x14a   :  { %553 = vmatpush1.msra.mxu1 %v3324_v53  ;;  %v3363_v3 = vrot.slane %v335_v1, %v3255_v21  ;;  %v3448_v51 = vcombine.high %v3366_v6, %v3366_v6 }
 0x14b   :  { %554 = vmatprep.subr.mxu1 %v3330_v54 }
 0x14c   :  { %555 = vmatpush1.msra.mxu1 %v3337_v55  ;;  %v3371_v10 = vcombine.high %v3363_v3, %v3363_v3 }
 0x14d   :  { %911 = vmatprep.subr.mxu1 %v3278_v34 }
 0x205   :  { %v187_v60 = vpop.f32.mrf.mxu1 }
 0x206   :  { %v188_v61 = vadd.f32 %v187_v60, %v116_v59 }
 0x207   :  { %v2895_v62 = vpop.f32.mrf.mxu1 }
 0x208   :  { %2780 = vmatmul.mubr.msk.f32.vlgmr.msra.gmra.mxu0 %vm117_vm4, %v188_v61 }
 0x209   :  { %730 = vmatpush1.msra.mxu0 %v3288_v42  ;;  %769 = vmatprep.mubr.f32.mxu0 %v3196_v5 }
 0x20a   :  { %731 = vmatprep.subr.mxu0 %v3294_v43 }
 0x20b   :  { %732 = vmatpush1.msra.mxu0 %v3300_v44 }
 0x20c   :  { %733 = vmatprep.subr.mxu0 %v3306_v45 }
 0x20d   :  { %734 = vmatpush1.msra.mxu0 %v3324_v53 }
 0x20e   :  { %735 = vmatprep.subr.mxu0 %v3330_v54 }
 0x20f   :  { %736 = vmatpush1.msra.mxu0 %v3337_v55 }
 0x210   :  { %1091 = vmatprep.subr.mxu0 %v3278_v34 }
 0x2c8   :  { %v443_v4 = vpop.f32.mrf.mxu0 }
 0x2c9   :  { %v454_v7 = vrot.slane %v443_v4, %v3255_v21 }
 0x2ca   :  { %v445_v8 = vpop.f32.mrf.mxu0 }
 0x2cb   :  { %v455_v11 = vrot.slane %v454_v7, 1  ;;  %v458_v12 = vadd.f32 %v454_v7, %v3366_v6 }
 0x2cd   :  { %v459_v13 = vadd.f32 %v455_v11, %v3371_v10  ;;  %3027 = vtanh.f32 %v458_v12  ;;  %v2781_v16 = vmul.f32 -1.442695, %v458_v12 }
 0x2cf   :  { %3029 = vtanh.f32 %v459_v13  ;;  %v2782_v17 = vmul.f32 -1.442695, %v459_v13 }
 0x2d0   :  { %3031 = vpow2.f32 %v2781_v16 }
 0x2d1   :  { %3033 = vpow2.f32 %v2782_v17 }
 0x2da   :  { %v3028_v14 = vpop.eup %3027 }
 0x2db   :  { %478 = vrot.lane.b32.xlu0 %v3028_v14, %s3200_s25 }
 0x2dc   :  { %v3030_v15 = vpop.eup %3029 }
 0x2dd   :  { %480 = vrot.lane.b32.xlu1 %v3030_v15, %s3200_s25  ;;  %v3032_v18 = vpop.eup %3031 }
 0x2de   :  { %v3034_v19 = vpop.eup %3033  ;;  %v466_v20 = vadd.f32 1.0, %v3032_v18 }
 0x2df   :  { %v467_v22 = vadd.f32 1.0, %v3034_v19 }
 0x2e0   :  { %3035 = vrcp.f32 %v466_v20 }
 0x2e1   :  { %3037 = vrcp.f32 %v467_v22 }
 0x2ed   :  { %v3036_v23 = vpop.eup %3035 }
 0x2ee   :  { %v3038_v26 = vpop.eup %3037  ;;  %v474_v29 = vmul.f32 0.0, %v3036_v23 }
 0x2ef   :  { %v475_v32 = vmul.f32 0.0, %v3038_v26 }
 0x34d   :  { %v479_v24 = vpop.permute.xlu0 %478 }
 0x34e   :  { %v484_v25 = vmul.f32 %v3036_v23, %v479_v24 }
 0x34f   :  { %v481_v27 = vpop.permute.xlu1 %480 }
 0x350   :  { %488 = vrot.lane.b32.xlu1 %v484_v25, %s3201_s26  ;;  %v485_v28 = vmul.f32 %v3038_v26, %v481_v27 }
 0x352   :  { %490 = vrot.lane.b32.xlu0 %v485_v28, %s3201_s26 }
 0x3c2   :  { %v489_v30 = vpop.permute.xlu1 %488 }
 0x3c3   :  { %v3379_v31 = vadd.f32 %v489_v30, %v474_v29 }
 0x3c4   :  { %v491_v33 = vpop.permute.xlu0 %490 }
 0x3c5   :  { %3039 = vtanh.f32 %v3379_v31  ;;  %v3382_v35 = vadd.f32 %v491_v33, %v475_v32  ;;  %v652_v27 = vrot.slane %v3379_v31, 7  ;;  %v3430_v31 = vsub.s32 1, %v3240_v9 }
 0x3c7   :  { %3041 = vtanh.f32 %v3382_v35  ;;  %v653_v25 = vrot.slane %v3382_v35, 7 }
 0x3d2   :  { %v3040_v36 = vpop.eup %3039 }
 0x3d3   :  { %500 = vrot.lane.b32.xlu1 %v3040_v36, %s3200_s25 }
 0x3d4   :  { %v3042_v37 = vpop.eup %3041 }
 0x3d5   :  { %502 = vrot.lane.b32.xlu0 %v3042_v37, %s3200_s25 }
 0x445   :  { %v501_v38 = vpop.permute.xlu1 %500 }
 0x446   :  { %v506_v40 = vmul.f32 %v3036_v23, %v501_v38 }
 0x447   :  { %v503_v41 = vpop.permute.xlu0 %502 }
 0x448   :  { %v507_v46 = vmul.f32 %v3038_v26, %v503_v41  ;;  %v513_v47 = vrot.slane %v506_v40, %v3388_v39 }
 0x44a   :  { %v517_v48 = vrot.slane %v507_v46, %v3388_v39 }
 0x44c   :  { %v519_v49 = vsel %vm518_vm5, %v517_v48, %v513_v47 }
 0x44d   :  { %520 = vrot.lane.b32.xlu1 %v519_v49, %s3201_s26 }
 0x4bf   :  { %v521_v50 = vpop.permute.xlu1 %520 }
 0x4c0   :  { %2783 = vmatmul.mubr.msk.f32.vlgmr.msra.gmra.mxu1 %vm117_vm4, %v521_v50 }
 0x4c1   :  { %912 = vmatpush1.msra.mxu1 %v3288_v42  ;;  %951 = vmatprep.mubr.f32.mxu1 %v3196_v5 }
 0x4c2   :  { %913 = vmatprep.subr.mxu1 %v3294_v43 }
 0x4c3   :  { %914 = vmatpush1.msra.mxu1 %v3300_v44 }
 0x4c4   :  { %915 = vmatprep.subr.mxu1 %v3306_v45 }
 0x4c5   :  { %916 = vmatpush1.msra.mxu1 %v3324_v53 }
 0x4c6   :  { %917 = vmatprep.subr.mxu1 %v3330_v54 }
 0x4c7   :  { %918 = vmatpush1.msra.mxu1 %v3337_v55 }
 0x4c8   :  { %1273 = vmatprep.subr.mxu1 %v3278_v34 }
 0x580   :  { %v590_v59 = vpop.f32.mrf.mxu1 }
 0x581   :  { %v630_v60 = vrot.slane %v590_v59, %v3255_v21  ;;  %v3453_v59 = vrot.slane %v3347_v58, %v3255_v21 }
 0x582   :  { %v592_v61 = vpop.f32.mrf.mxu1 }
 0x583   :  { %v631_v62 = vrot.slane %v630_v60, 7  ;;  %v635_v63 = vadd.f32 %v630_v60, %v3371_v10  ;;  %v602_v0 = vrot.slane %v592_v61, %v3405_v57 }
 0x585   :  { %v634_v1 = vadd.f32 %v631_v62, %v3366_v6  ;;  %3043 = vtanh.f32 %v635_v63  ;;  %v603_v4 = vcombine.high %v602_v0, %v602_v0  ;;  %v610_v7 = vrot.slane %v602_v0, %v3405_v57 }
 0x586   :  { %v2785_v12 = vmul.f32 -1.442695, %v635_v63 }
 0x587   :  { %v617_v8 = vrot.slane %v603_v4, %v3405_v57  ;;  %3045 = vtanh.f32 %v634_v1  ;;  %621 = vst.msk [vmem:[#allocation2] sm:$0x1] %vm620_vm6, %v610_v7  ;;  %v2784_v13 = vmul.f32 -1.442695, %v634_v1 }
 0x588   :  { %3047 = vpow2.f32 %v2785_v12 }
 0x589   :  { %622 = vst.msk [vmem:[#allocation2 + $0x8] sm:$0x1] %vm620_vm6, %v617_v8  ;;  %3049 = vpow2.f32 %v2784_v13 }
 0x592   :  { %v3044_v11 = vpop.eup %3043 }
 0x593   :  { %662 = vrot.lane.b32.xlu1 %v3044_v11, %s3200_s25 }
 0x594   :  { %v3046_v10 = vpop.eup %3045 }
 0x595   :  { %660 = vrot.lane.b32.xlu0 %v3046_v10, %s3200_s25  ;;  %v3048_v14 = vpop.eup %3047 }
 0x596   :  { %v3050_v15 = vpop.eup %3049  ;;  %v643_v16 = vadd.f32 1.0, %v3048_v14 }
 0x597   :  { %v642_v17 = vadd.f32 1.0, %v3050_v15 }
 0x598   :  { %3051 = vrcp.f32 %v643_v16 }
 0x599   :  { %3053 = vrcp.f32 %v642_v17 }
 0x5a5   :  { %v3052_v18 = vpop.eup %3051 }
 0x5a6   :  { %v3054_v22 = vpop.eup %3053  ;;  %v657_v26 = vmul.f32 %v3052_v18, %v653_v25 }
 0x5a7   :  { %v656_v30 = vmul.f32 %v3054_v22, %v652_v27 }
 0x605   :  { %v663_v19 = vpop.permute.xlu1 %662 }
 0x606   :  { %v667_v20 = vmul.f32 %v3052_v18, %v663_v19 }
 0x607   :  { %v661_v23 = vpop.permute.xlu0 %660 }
 0x608   :  { %672 = vrot.lane.b32.xlu1 %v667_v20, %s3201_s26  ;;  %v666_v24 = vmul.f32 %v3054_v22, %v661_v23 }
 0x60a   :  { %670 = vrot.lane.b32.xlu0 %v666_v24, %s3201_s26 }
 0x67a   :  { %v673_v28 = vpop.permute.xlu1 %672 }
 0x67b   :  { %v3421_v29 = vadd.f32 %v673_v28, %v657_v26 }
 0x67c   :  { %v671_v32 = vpop.permute.xlu0 %670 }
 0x67d   :  { %3055 = vtanh.f32 %v3421_v29  ;;  %v3424_v33 = vadd.f32 %v671_v32, %v656_v30  ;;  %v2790_v23 = vrot.slane %v3421_v29, 9 }
 0x67f   :  { %3057 = vtanh.f32 %v3424_v33  ;;  %v2789_v20 = vrot.slane %v3424_v33, 9 }
 0x68a   :  { %v3056_v36 = vpop.eup %3055 }
 0x68b   :  { %684 = vrot.lane.b32.xlu1 %v3056_v36, %s3200_s25 }
 0x68c   :  { %v3058_v37 = vpop.eup %3057 }
 0x68d   :  { %682 = vrot.lane.b32.xlu0 %v3058_v37, %s3200_s25 }
 0x6fd   :  { %v685_v35 = vpop.permute.xlu1 %684 }
 0x6fe   :  { %v689_v38 = vmul.f32 %v3052_v18, %v685_v35 }
 0x6ff   :  { %v683_v40 = vpop.permute.xlu0 %682 }
 0x700   :  { %v688_v41 = vmul.f32 %v3054_v22, %v683_v40  ;;  %v699_v46 = vrot.slane %v689_v38, %v3430_v31 }
 0x702   :  { %v695_v47 = vrot.slane %v688_v41, %v3430_v31 }
 0x704   :  { %v700_v48 = vsel %vm518_vm5, %v699_v46, %v695_v47 }
 0x705   :  { %701 = vrot.lane.b32.xlu0 %v700_v48, %s3201_s26 }
 0x777   :  { %v702_v49 = vpop.permute.xlu0 %701 }
 0x778   :  { %2786 = vmatmul.mubr.msk.f32.vlgmr.msra.gmra.mxu0 %vm117_vm4, %v702_v49 }
 0x779   :  { %1092 = vmatpush1.msra.mxu0 %v3288_v42  ;;  %1131 = vmatprep.mubr.f32.mxu0 %v3196_v5 }
 0x77a   :  { %1093 = vmatprep.subr.mxu0 %v3294_v43 }
 0x77b   :  { %1094 = vmatpush1.msra.mxu0 %v3300_v44 }
 0x77c   :  { %1095 = vmatprep.subr.mxu0 %v3306_v45 }
 0x77d   :  { %1096 = vmatpush1.msra.mxu0 %v3324_v53 }
 0x77e   :  { %1097 = vmatprep.subr.mxu0 %v3330_v54 }
 0x77f   :  { %1098 = vmatpush1.msra.mxu0 %v3337_v55 }
 0x780   :  { %2901 = vmatprep.subr.mxu0 %v3196_v5 }
 0x838   :  { %v771_v50 = vpop.f32.mrf.mxu0 }
 0x839   :  { %v810_v52 = vrot.slane %v771_v50, %v3255_v21 }
 0x83a   :  { %v773_v56 = vpop.f32.mrf.mxu0 }
 0x83b   :  { %v811_v60 = vrot.slane %v810_v52, 1  ;;  %v814_v61 = vadd.f32 %v810_v52, %v3448_v51  ;;  %v783_v62 = vrot.slane %v773_v56, %v3405_v57 }
 0x83d   :  { %v815_v63 = vadd.f32 %v811_v60, %v3453_v59  ;;  %3059 = vtanh.f32 %v814_v61  ;;  %v784_v0 = vcombine.high %v783_v62, %v783_v62  ;;  %v791_v1 = vrot.slane %v783_v62, %v3405_v57 }
 0x83e   :  { %v2787_v7 = vmul.f32 -1.442695, %v814_v61 }
 0x83f   :  { %v798_v6 = vrot.slane %v784_v0, %v3405_v57  ;;  %3061 = vtanh.f32 %v815_v63  ;;  %801 = vst.msk [vmem:[#allocation2 + $0x1] sm:$0x1] %vm620_vm6, %v791_v1  ;;  %v2788_v8 = vmul.f32 -1.442695, %v815_v63 }
 0x840   :  { %3063 = vpow2.f32 %v2787_v7 }
 0x841   :  { %802 = vst.msk [vmem:[#allocation2 + $0x9] sm:$0x1] %vm620_vm6, %v798_v6  ;;  %3065 = vpow2.f32 %v2788_v8 }
 0x84a   :  { %v3060_v58 = vpop.eup %3059 }
 0x84b   :  { %842 = vrot.lane.b32.xlu1 %v3060_v58, %s3200_s25 }
 0x84c   :  { %v3062_v4 = vpop.eup %3061 }
 0x84d   :  { %844 = vrot.lane.b32.xlu0 %v3062_v4, %s3200_s25  ;;  %v3064_v11 = vpop.eup %3063 }
 0x84e   :  { %v3066_v10 = vpop.eup %3065  ;;  %v822_v12 = vadd.f32 1.0, %v3064_v11 }
 0x84f   :  { %v823_v13 = vadd.f32 1.0, %v3066_v10 }
 0x850   :  { %3067 = vrcp.f32 %v822_v12 }
 0x851   :  { %3069 = vrcp.f32 %v823_v13 }
 0x85d   :  { %v3068_v14 = vpop.eup %3067 }
 0x85e   :  { %v3070_v17 = vpop.eup %3069  ;;  %v838_v22 = vmul.f32 %v3068_v14, %v2789_v20 }
 0x85f   :  { %v839_v26 = vmul.f32 %v3070_v17, %v2790_v23 }
 0x8bd   :  { %v843_v15 = vpop.permute.xlu1 %842 }
 0x8be   :  { %v848_v16 = vmul.f32 %v3068_v14, %v843_v15 }
 0x8bf   :  { %v845_v18 = vpop.permute.xlu0 %844 }
 0x8c0   :  { %852 = vrot.lane.b32.xlu1 %v848_v16, %s3201_s26  ;;  %v849_v19 = vmul.f32 %v3070_v17, %v845_v18 }
 0x8c2   :  { %854 = vrot.lane.b32.xlu0 %v849_v19, %s3201_s26 }
 0x932   :  { %v853_v24 = vpop.permute.xlu1 %852 }
 0x933   :  { %v3468_v25 = vadd.f32 %v853_v24, %v838_v22 }
 0x934   :  { %v855_v27 = vpop.permute.xlu0 %854 }
 0x935   :  { %3071 = vtanh.f32 %v3468_v25  ;;  %v3471_v28 = vadd.f32 %v855_v27, %v839_v26  ;;  %v1014_v13 = vrot.slane %v3468_v25, 7 }
 0x937   :  { %3073 = vtanh.f32 %v3471_v28  ;;  %v1015_v10 = vrot.slane %v3471_v28, 7 }
 0x942   :  { %v3072_v30 = vpop.eup %3071 }
 0x943   :  { %864 = vrot.lane.b32.xlu1 %v3072_v30, %s3200_s25 }
 0x944   :  { %v3074_v32 = vpop.eup %3073 }
 0x945   :  { %866 = vrot.lane.b32.xlu0 %v3074_v32, %s3200_s25 }
 0x9b5   :  { %v865_v33 = vpop.permute.xlu1 %864 }
 0x9b6   :  { %v870_v36 = vmul.f32 %v3068_v14, %v865_v33 }
 0x9b7   :  { %v867_v29 = vpop.permute.xlu0 %866 }
 0x9b8   :  { %v871_v37 = vmul.f32 %v3070_v17, %v867_v29  ;;  %v877_v35 = vrot.slane %v870_v36, %v3388_v39  ;;  %v3530_v36 = vcombine.high %v3453_v59, %v3453_v59 }
 0x9ba   :  { %v881_v38 = vrot.slane %v871_v37, %v3388_v39 }
 0x9bc   :  { %v882_v40 = vsel %vm518_vm5, %v881_v38, %v877_v35 }
 0x9bd   :  { %883 = vrot.lane.b32.xlu1 %v882_v40, %s3201_s26 }
 0xa2f   :  { %v884_v41 = vpop.permute.xlu1 %883 }
 0xa30   :  { %2791 = vmatmul.mubr.msk.f32.vlgmr.msra.gmra.mxu1 %vm117_vm4, %v884_v41 }
 0xa31   :  { %1274 = vmatpush1.msra.mxu1 %v3288_v42  ;;  %1313 = vmatprep.mubr.f32.mxu1 %v3196_v5 }
 0xa32   :  { %1275 = vmatprep.subr.mxu1 %v3294_v43 }
 0xa33   :  { %1276 = vmatpush1.msra.mxu1 %v3300_v44 }
 0xa34   :  { %1277 = vmatprep.subr.mxu1 %v3306_v45 }
 0xa35   :  { %1278 = vmatpush1.msra.mxu1 %v3324_v53 }
 0xa36   :  { %1279 = vmatprep.subr.mxu1 %v3330_v54 }
 0xa37   :  { %1280 = vmatpush1.msra.mxu1 %v3337_v55 }
 0xa38   :  { %2912 = vmatprep.subr.mxu1 %v3196_v5 }
 0xaf0   :  { %v953_v46 = vpop.f32.mrf.mxu1 }
 0xaf1   :  { %v992_v47 = vrot.slane %v953_v46, %v3255_v21 }
 0xaf2   :  { %v955_v42 = vpop.f32.mrf.mxu1 }
 0xaf3   :  { %v993_v48 = vrot.slane %v992_v47, 7  ;;  %v997_v49 = vadd.f32 %v992_v47, %v3453_v59  ;;  %v965_v50 = vrot.slane %v955_v42, %v3405_v57 }
 0xaf5   :  { %v996_v44 = vadd.f32 %v993_v48, %v3448_v51  ;;  %3075 = vtanh.f32 %v997_v49  ;;  %v966_v52 = vcombine.high %v965_v50, %v965_v50  ;;  %v973_v53 = vrot.slane %v965_v50, %v3405_v57 }
 0xaf6   :  { %v2793_v61 = vmul.f32 -1.442695, %v997_v49 }
 0xaf7   :  { %v980_v56 = vrot.slane %v966_v52, %v3405_v57  ;;  %3077 = vtanh.f32 %v996_v44  ;;  %983 = vst.msk [vmem:[#allocation2 + $0x2] sm:$0x1] %vm620_vm6, %v973_v53  ;;  %v2792_v62 = vmul.f32 -1.442695, %v996_v44 }
 0xaf8   :  { %3079 = vpow2.f32 %v2793_v61 }
 0xaf9   :  { %984 = vst.msk [vmem:[#allocation2 + $0xa] sm:$0x1] %vm620_vm6, %v980_v56  ;;  %3081 = vpow2.f32 %v2792_v62 }
 0xb02   :  { %v3076_v55 = vpop.eup %3075 }
 0xb03   :  { %1024 = vrot.lane.b32.xlu1 %v3076_v55, %s3200_s25 }
 0xb04   :  { %v3078_v60 = vpop.eup %3077 }
 0xb05   :  { %1022 = vrot.lane.b32.xlu0 %v3078_v60, %s3200_s25  ;;  %v3080_v51 = vpop.eup %3079 }
 0xb06   :  { %v3082_v63 = vpop.eup %3081  ;;  %v1005_v0 = vadd.f32 1.0, %v3080_v51 }
 0xb07   :  { %v1004_v1 = vadd.f32 1.0, %v3082_v63 }
 0xb08   :  { %3083 = vrcp.f32 %v1005_v0 }
 0xb09   :  { %3085 = vrcp.f32 %v1004_v1 }
 0xb15   :  { %v3084_v6 = vpop.eup %3083 }
 0xb16   :  { %v3086_v7 = vpop.eup %3085  ;;  %v1019_v12 = vmul.f32 %v3084_v6, %v1015_v10 }
 0xb17   :  { %v1018_v16 = vmul.f32 %v3086_v7, %v1014_v13 }
 0xb75   :  { %v1025_v58 = vpop.permute.xlu1 %1024 }
 0xb76   :  { %v1029_v4 = vmul.f32 %v3084_v6, %v1025_v58 }
 0xb77   :  { %v1023_v8 = vpop.permute.xlu0 %1022 }
 0xb78   :  { %1034 = vrot.lane.b32.xlu1 %v1029_v4, %s3201_s26  ;;  %v1028_v11 = vmul.f32 %v3086_v7, %v1023_v8 }
 0xb7a   :  { %1032 = vrot.lane.b32.xlu0 %v1028_v11, %s3201_s26 }
 0xbea   :  { %v1035_v14 = vpop.permute.xlu1 %1034 }
 0xbeb   :  { %v3504_v15 = vadd.f32 %v1035_v14, %v1019_v12 }
 0xbec   :  { %v1033_v17 = vpop.permute.xlu0 %1032 }
 0xbed   :  { %3087 = vtanh.f32 %v3504_v15  ;;  %v3507_v18 = vadd.f32 %v1033_v17, %v1018_v16  ;;  %v2798_v62 = vrot.slane %v3504_v15, 9 }
 0xbef   :  { %3089 = vtanh.f32 %v3507_v18  ;;  %v2797_v60 = vrot.slane %v3507_v18, 9 }
 0xbfa   :  { %v3088_v19 = vpop.eup %3087 }
 0xbfb   :  { %1046 = vrot.lane.b32.xlu1 %v3088_v19, %s3200_s25 }
 0xbfc   :  { %v3090_v20 = vpop.eup %3089 }
 0xbfd   :  { %1044 = vrot.lane.b32.xlu0 %v3090_v20, %s3200_s25 }
 0xc6d   :  { %v1047_v22 = vpop.permute.xlu1 %1046 }
 0xc6e   :  { %v1051_v23 = vmul.f32 %v3084_v6, %v1047_v22 }
 0xc6f   :  { %v1045_v24 = vpop.permute.xlu0 %1044 }
 0xc70   :  { %v1050_v25 = vmul.f32 %v3086_v7, %v1045_v24  ;;  %v1061_v26 = vrot.slane %v1051_v23, %v3430_v31 }
 0xc72   :  { %v1057_v27 = vrot.slane %v1050_v25, %v3430_v31 }
 0xc74   :  { %v1062_v28 = vsel %vm518_vm5, %v1061_v26, %v1057_v27 }
 0xc75   :  { %1063 = vrot.lane.b32.xlu0 %v1062_v28, %s3201_s26 }
 0xce7   :  { %v1064_v30 = vpop.permute.xlu0 %1063 }
 0xce8   :  { %2794 = vmatmul.mubr.msk.f32.vlgmr.msra.gmra.mxu0 %vm117_vm4, %v1064_v30 }
 0xce9   :  { %2902 = vmatpush3.msra.mxu0 %v3278_v34  ;;  %2909 = vmatprep.mubr.msk.f32.mxu0 %vm3197_vm0, %v3196_v5 }
 0xcea   :  { %2903 = vmatprep.subr.mxu0 %v3196_v5 }
 0xceb   :  { %2904 = vmatpush3.msra.mxu0 %v3294_v43 }
 0xcec   :  { %2905 = vmatprep.subr.mxu0 %v3196_v5 }
 0xced   :  { %2906 = vmatpush3.msra.mxu0 %v3306_v45 }
 0xcee   :  { %2907 = vmatprep.subr.mxu0 %v3196_v5 }
 0xcef   :  { %2908 = vmatpush3.msra.mxu0 %v3330_v54 }
 0xcf0   :  { %2925 = vmatprep.subr.mxu0 %v3196_v5 }
 0xda8   :  { %v1133_v32 = vpop.f32.mrf.mxu0 }
 0xda9   :  { %v1172_v34 = vrot.slane %v1133_v32, %v3255_v21 }
 0xdaa   :  { %v1135_v33 = vpop.f32.mrf.mxu0 }
 0xdab   :  { %v1173_v29 = vrot.slane %v1172_v34, 1  ;;  %v1176_v43 = vadd.f32 %v1172_v34, %v3363_v3  ;;  %v1145_v37 = vrot.slane %v1135_v33, %v3405_v57 }
 0xdad   :  { %v1177_v45 = vadd.f32 %v1173_v29, %v3530_v36  ;;  %3091 = vtanh.f32 %v1176_v43  ;;  %v1146_v35 = vcombine.high %v1145_v37, %v1145_v37  ;;  %v1153_v54 = vrot.slane %v1145_v37, %v3405_v57 }
 0xdae   :  { %v2795_v41 = vmul.f32 -1.442695, %v1176_v43 }
 0xdaf   :  { %v1160_v38 = vrot.slane %v1146_v35, %v3405_v57  ;;  %3093 = vtanh.f32 %v1177_v45  ;;  %1163 = vst.msk [vmem:[#allocation2 + $0x3] sm:$0x1] %vm620_vm6, %v1153_v54  ;;  %v2796_v46 = vmul.f32 -1.442695, %v1177_v45 }
 0xdb0   :  { %3095 = vpow2.f32 %v2795_v41 }
 0xdb1   :  { %1164 = vst.msk [vmem:[#allocation2 + $0xb] sm:$0x1] %vm620_vm6, %v1160_v38  ;;  %3097 = vpow2.f32 %v2796_v46 }
 0xdba   :  { %v3092_v59 = vpop.eup %3091 }
 0xdbb   :  { %1204 = vrot.lane.b32.xlu1 %v3092_v59, %s3200_s25 }
 0xdbc   :  { %v3094_v40 = vpop.eup %3093 }
 0xdbd   :  { %1206 = vrot.lane.b32.xlu0 %v3094_v40, %s3200_s25  ;;  %v3096_v47 = vpop.eup %3095 }
 0xdbe   :  { %v3098_v42 = vpop.eup %3097  ;;  %v1184_v48 = vadd.f32 1.0, %v3096_v47 }
 0xdbf   :  { %v1185_v49 = vadd.f32 1.0, %v3098_v42 }
 0xdc0   :  { %3099 = vrcp.f32 %v1184_v48 }
 0xdc1   :  { %3101 = vrcp.f32 %v1185_v49 }
 0xdcd   :  { %v3100_v50 = vpop.eup %3099 }
 0xdce   :  { %v3102_v53 = vpop.eup %3101  ;;  %v1200_v61 = vmul.f32 %v3100_v50, %v2797_v60 }
 0xdcf   :  { %v1201_v0 = vmul.f32 %v3102_v53, %v2798_v62 }
 0xe2d   :  { %v1205_v44 = vpop.permute.xlu1 %1204 }
 0xe2e   :  { %v1210_v52 = vmul.f32 %v3100_v50, %v1205_v44  ;;  %v3576_v44 = vld [vmem:[%s3931_s1 + $0x130] sm:$0xff] }
 0xe2f   :  { %v1207_v56 = vpop.permute.xlu0 %1206 }
 0xe30   :  { %1214 = vrot.lane.b32.xlu1 %v1210_v52, %s3201_s26  ;;  %v1211_v55 = vmul.f32 %v3102_v53, %v1207_v56  ;;  %v3581_v52 = vld [vmem:[%s3931_s1 + $0x120] sm:$0xff] }
 0xe32   :  { %1216 = vrot.lane.b32.xlu0 %v1211_v55, %s3201_s26  ;;  %v3595_v55 = vld [vmem:[%s3931_s1 + $0x100] sm:$0xff] }
 0xea2   :  { %v1215_v51 = vpop.permute.xlu1 %1214 }
 0xea3   :  { %v3545_v63 = vadd.f32 %v1215_v51, %v1200_v61  ;;  %v3606_v61 = vld [vmem:[%s3931_s1 + $0xf0] sm:$0xff] }
 0xea4   :  { %v1217_v1 = vpop.permute.xlu0 %1216 }
 0xea5   :  { %3103 = vtanh.f32 %v3545_v63  ;;  %v1221_v6 = vadd.f32 %v1217_v1, %v1201_v0  ;;  %v1376_v59 = vrot.slane %v3545_v63, 7 }
 0xea7   :  { %3105 = vtanh.f32 %v1221_v6  ;;  %v1377_v54 = vrot.slane %v1221_v6, 7 }
 0xeb2   :  { %v3104_v58 = vpop.eup %3103 }
 0xeb3   :  { %1226 = vrot.lane.b32.xlu1 %v3104_v58, %s3200_s25 }
 0xeb4   :  { %v3106_v4 = vpop.eup %3105 }
 0xeb5   :  { %1228 = vrot.lane.b32.xlu0 %v3106_v4, %s3200_s25  ;;  %v1541_v4 = vld [vmem:[%s3931_s1 + $0x1a0] ss:$0 sm:$0xff] }
 0xf25   :  { %v1227_v7 = vpop.permute.xlu1 %1226 }
 0xf26   :  { %v1232_v8 = vmul.f32 %v3100_v50, %v1227_v7 }
 0xf27   :  { %v1229_v11 = vpop.permute.xlu0 %1228 }
 0xf28   :  { %v1233_v10 = vmul.f32 %v3102_v53, %v1229_v11  ;;  %v1239_v12 = vrot.slane %v1232_v8, %v3388_v39  ;;  %v3588_v53 = vld [vmem:[%s3931_s1 + $0x110] sm:$0xff]  ;;  %v3634_v11 = vld [vmem:[%s3931_s1 + $0x140] ss:$0 sm:$0xff] }
 0xf2a   :  { %v1243_v13 = vrot.slane %v1233_v10, %v3388_v39 }
 0xf2c   :  { %v1244_v14 = vsel %vm518_vm5, %v1243_v13, %v1239_v12 }
 0xf2d   :  { %1245 = vrot.lane.b32.xlu1 %v1244_v14, %s3201_s26 }
 0xf9f   :  { %v1246_v15 = vpop.permute.xlu1 %1245 }
 0xfa0   :  { %2799 = vmatmul.mubr.msk.f32.vlgmr.msra.gmra.mxu1 %vm117_vm4, %v1246_v15 }
 0xfa1   :  { %2922 = vmatprep.mubr.msk.f32.mxu1 %vm3197_vm0, %v3196_v5  ;;  %2913 = vmatpush3.msra.mxu1 %v3576_v44 }
 0xfa2   :  { %2914 = vmatprep.subr.mxu1 %v3196_v5 }
 0xfa3   :  { %2915 = vmatpush3.msra.mxu1 %v3581_v52 }
 0xfa4   :  { %2916 = vmatprep.subr.mxu1 %v3196_v5 }
 0xfa5   :  { %2917 = vmatpush3.msra.mxu1 %v3588_v53 }
 0xfa6   :  { %2918 = vmatprep.subr.mxu1 %v3196_v5 }
 0xfa7   :  { %2919 = vmatpush3.msra.mxu1 %v3595_v55 }
 0xfa8   :  { %2920 = vmatprep.subr.mxu1 %v3196_v5 }
 0xfa9   :  { %2921 = vmatpush3.msra.mxu1 %v3606_v61 }
 0xfaa   :  { %2936 = vmatprep.subr.mxu1 %v3196_v5 }
0x1060   :  { %v1315_v16 = vpop.f32.mrf.mxu1 }
0x1061   :  { %v1354_v17 = vrot.slane %v1315_v16, %v3255_v21 }
0x1062   :  { %v1317_v18 = vpop.f32.mrf.mxu1 }
0x1063   :  { %v1355_v19 = vrot.slane %v1354_v17, 7  ;;  %v1359_v20 = vadd.f32 %v1354_v17, %v3530_v36  ;;  %v1327_v22 = vrot.slane %v1317_v18, %v3405_v57 }
0x1065   :  { %v1358_v23 = vadd.f32 %v1355_v19, %v3363_v3  ;;  %3107 = vtanh.f32 %v1359_v20  ;;  %v1328_v24 = vcombine.high %v1327_v22, %v1327_v22  ;;  %v1335_v25 = vrot.slane %v1327_v22, %v3405_v57 }
0x1066   :  { %v2801_v28 = vmul.f32 -1.442695, %v1359_v20 }
0x1067   :  { %v1342_v26 = vrot.slane %v1328_v24, %v3405_v57  ;;  %3109 = vtanh.f32 %v1358_v23  ;;  %1345 = vst.msk [vmem:[#allocation2 + $0x4] sm:$0x1] %vm620_vm6, %v1335_v25  ;;  %v2800_v30 = vmul.f32 -1.442695, %v1358_v23 }
0x1068   :  { %3111 = vpow2.f32 %v2801_v28  ;;  %v3662_v28 = vld [vmem:[%s3931_s1 + $0x160] sm:$0xff] }
0x1069   :  { %1346 = vst.msk [vmem:[#allocation2 + $0xc] sm:$0x1] %vm620_vm6, %v1342_v26  ;;  %3113 = vpow2.f32 %v2800_v30  ;;  %v3669_v30 = vld [vmem:[%s3931_s1 + $0x150] sm:$0xff] }
0x1072   :  { %v3108_v21 = vpop.eup %3107 }
0x1073   :  { %1386 = vrot.lane.b32.xlu1 %v3108_v21, %s3200_s25  ;;  %v3650_v21 = vld [vmem:[%s3931_s1 + $0x180] sm:$0xff] }
0x1074   :  { %v3110_v27 = vpop.eup %3109 }
0x1075   :  { %1384 = vrot.lane.b32.xlu0 %v3110_v27, %s3200_s25  ;;  %v3112_v3 = vpop.eup %3111  ;;  %v3655_v27 = vld [vmem:[%s3931_s1 + $0x170] sm:$0xff] }
0x1076   :  { %v3114_v32 = vpop.eup %3113  ;;  %v1367_v34 = vadd.f32 1.0, %v3112_v3 }
0x1077   :  { %v1366_v33 = vadd.f32 1.0, %v3114_v32 }
0x1078   :  { %3115 = vrcp.f32 %v1367_v34 }
0x1079   :  { %3117 = vrcp.f32 %v1366_v33 }
0x1085   :  { %v3116_v36 = vpop.eup %3115 }
0x1086   :  { %v3118_v37 = vpop.eup %3117  ;;  %v1381_v38 = vmul.f32 %v3116_v36, %v1377_v54 }
0x1087   :  { %v1380_v46 = vmul.f32 %v3118_v37, %v1376_v59 }
0x10e5   :  { %v1387_v29 = vpop.permute.xlu1 %1386 }
0x10e6   :  { %v1391_v43 = vmul.f32 %v3116_v36, %v1387_v29 }
0x10e7   :  { %v1385_v45 = vpop.permute.xlu0 %1384 }
0x10e8   :  { %1396 = vrot.lane.b32.xlu1 %v1391_v43, %s3201_s26  ;;  %v1390_v35 = vmul.f32 %v3118_v37, %v1385_v45 }
0x10ea   :  { %1394 = vrot.lane.b32.xlu0 %v1390_v35, %s3201_s26 }
0x115a   :  { %v1397_v40 = vpop.permute.xlu1 %1396 }
0x115b   :  { %v1401_v41 = vadd.f32 %v1397_v40, %v1381_v38 }
0x115c   :  { %v1395_v47 = vpop.permute.xlu0 %1394 }
0x115d   :  { %3119 = vtanh.f32 %v1401_v41  ;;  %v1400_v42 = vadd.f32 %v1395_v47, %v1380_v46  ;;  %v1636_v48 = vrot.slane %v1401_v41, %v3430_v31 }
0x115f   :  { %3121 = vtanh.f32 %v1400_v42  ;;  %v1632_v49 = vrot.slane %v1400_v42, %v3430_v31 }
0x1161   :  { %v1637_v50 = vsel %vm518_vm5, %v1636_v48, %v1632_v49 }
0x116a   :  { %v3120_v56 = vpop.eup %3119 }
0x116b   :  { %1408 = vrot.lane.b32.xlu1 %v3120_v56, %s3200_s25  ;;  %v3709_v56 = vld [vmem:[%s3931_s1 + $0x190] ss:$0 sm:$0xff] }
0x116c   :  { %v3122_v60 = vpop.eup %3121 }
0x116d   :  { %1406 = vrot.lane.b32.xlu0 %v3122_v60, %s3200_s25 }
0x11dd   :  { %v1409_v62 = vpop.permute.xlu1 %1408 }
0x11de   :  { %v1413_v51 = vmul.f32 %v3116_v36, %v1409_v62 }
0x11df   :  { %v1407_v63 = vpop.permute.xlu0 %1406 }
0x11e0   :  { %v1412_v0 = vmul.f32 %v3118_v37, %v1407_v63  ;;  %v1423_v1 = vrot.slane %v1413_v51, %v3430_v31 }
0x11e2   :  { %v1419_v6 = vrot.slane %v1412_v0, %v3430_v31 }
0x11e4   :  { %v1424_v58 = vsel %vm518_vm5, %v1423_v1, %v1419_v6  ;;  %v3716_v6 = vand.u32 127, %v18_v2  ;;  %v3204_v2 = vmov 0  }
0x11e5   :  { %1542 = vrot.lane.b32.xlu0 %v1424_v58, %s3203_s9  ;;  %3022 = vset.pattern.permute.xlu1 %v3204_v2 }
0x11e6   :  { %3023 = vset.pattern.permute.xlu0 %v3204_v2 }
0x1257   :  { %v1543_v7 = vpop.permute.xlu0 %1542 }
0x1258   :  { %v1545_v8 = vsel %vm27_vm1, %v1541_v4, %v1543_v7 }
0x1259   :  { %2923 = vmatmul.mubr.msk.f32.vlgmr.msra.gmra.mxu1 %vm1546_vm7, %v1545_v8 }
0x125a   :  { %2937 = vmatpush3.msra.mxu1 %v3576_v44  ;;  %2946 = vmatprep.mubr.msk.f32.mxu1 %vm3197_vm0, %v3196_v5 }
0x125b   :  { %2938 = vmatprep.subr.mxu1 %v3196_v5 }
0x125c   :  { %2939 = vmatpush3.msra.mxu1 %v3581_v52 }
0x125d   :  { %2940 = vmatprep.subr.mxu1 %v3196_v5 }
0x125e   :  { %2941 = vmatpush3.msra.mxu1 %v3588_v53 }
0x125f   :  { %2942 = vmatprep.subr.mxu1 %v3196_v5 }
0x1260   :  { %2943 = vmatpush3.msra.mxu1 %v3595_v55 }
0x1261   :  { %2944 = vmatprep.subr.mxu1 %v3196_v5 }
0x1262   :  { %2945 = vmatpush3.msra.mxu1 %v3606_v61 }
0x1263   :  { %2960 = vmatprep.subr.mxu1 %v3196_v5 }
0x1319   :  { %v1616_v10 = vpop.f32.mrf.mxu1 }
0x131a   :  { %v1617_v12 = vadd.f32 %v1616_v10, %v3634_v11 }
0x131b   :  { %v2924_v13 = vpop.f32.mrf.mxu1 }
0x131c   :  { %3123 = vtanh.f32 %v1617_v12  ;;  %v2804_v15 = vmul.f32 -1.442695, %v1617_v12 }
0x131e   :  { %3125 = vpow2.f32 %v2804_v15 }
0x1329   :  { %v3124_v14 = vpop.eup %3123 }
0x132a   :  { %1641 = vrot.lane.b32.xlu1 %v3124_v14, %s3200_s25 }
0x132b   :  { %v3126_v16 = vpop.eup %3125 }
0x132c   :  { %v1623_v17 = vadd.f32 1.0, %v3126_v16 }
0x132e   :  { %3127 = vrcp.f32 %v1623_v17 }
0x133b   :  { %v3128_v18 = vpop.eup %3127 }
0x133c   :  { %v1639_v22 = vmul.f32 %v3128_v18, %v1637_v50 }
0x139c   :  { %v1642_v19 = vpop.permute.xlu1 %1641 }
0x139d   :  { %v1644_v20 = vmul.f32 %v3128_v18, %v1642_v19 }
0x139f   :  { %1646 = vrot.lane.b32.xlu0 %v1644_v20, %s3201_s26 }
0x13a3   :  { %1425 = vrot.lane.b32.xlu0 %v1424_v58, %s3201_s26  ;;  %v3720_v58 = vsub.s32 %v3716_v6, %v3240_v9 }
0x1411   :  { %v1647_v23 = vpop.permute.xlu0 %1646 }
0x1412   :  { %v3640_v24 = vadd.f32 %v1647_v23, %v1639_v22 }
0x1414   :  { %3129 = vtanh.f32 %v3640_v24 }
0x1415   :  { %v1426_v25 = vpop.permute.xlu0 %1425 }
0x1416   :  { %2910 = vmatmul.mubr.msk.f32.vlgmr.msra.gmra.mxu0 %vm117_vm4, %v1426_v25 }
0x1417   :  { %2933 = vmatprep.mubr.msk.f32.mxu0 %vm3197_vm0, %v3196_v5  ;;  %2926 = vmatpush3.msra.mxu0 %v3650_v21 }
0x1418   :  { %2927 = vmatprep.subr.mxu0 %v3196_v5 }
0x1419   :  { %2928 = vmatpush3.msra.mxu0 %v3655_v27 }
0x141a   :  { %2929 = vmatprep.subr.mxu0 %v3196_v5 }
0x141b   :  { %2930 = vmatpush3.msra.mxu0 %v3662_v28 }
0x141c   :  { %2931 = vmatprep.subr.mxu0 %v3196_v5 }
0x141d   :  { %2932 = vmatpush3.msra.mxu0 %v3669_v30 }
0x141e   :  { %2949 = vmatprep.subr.mxu0 %v3196_v5 }
0x1421   :  { %v3130_v26 = vpop.eup %3129 }
0x1422   :  { %1652 = vrot.lane.b32.xlu1 %v3130_v26, %s3200_s25 }
0x1494   :  { %v1653_v3 = vpop.permute.xlu1 %1652 }
0x1495   :  { %v3675_v32 = vmul.f32 %v3128_v18, %v1653_v3 }
0x1497   :  { %1657 = vrot.lane.b32.xlu1 %v3675_v32, %s3201_s26 }
0x14d6   :  { %v1495_v34 = vpop.f32.mrf.mxu0 }
0x14d7   :  { %v1506_v33 = vrot.slane %v1495_v34, %v3405_v57 }
0x14d8   :  { %v2911_v36 = vpop.f32.mrf.mxu0 }
0x14d9   :  { %v1507_v29 = vcombine.high %v1506_v33, %v1506_v33  ;;  %v1514_v43 = vrot.slane %v1506_v33, %v3405_v57 }
0x14db   :  { %v1521_v37 = vrot.slane %v1507_v29, %v3405_v57  ;;  %1524 = vst.msk [vmem:[#allocation2 + $0x5] sm:$0x1] %vm620_vm6, %v1514_v43 }
0x14dd   :  { %1525 = vst.msk [vmem:[#allocation2 + $0xd] sm:$0x1] %vm620_vm6, %v1521_v37 }
0x14e2   :  { %v3699_v47 = vld [vmem:[#allocation2] sm:$0x3f] }
0x14e4   :  { %v3703_v49 = vld [vmem:[#allocation2 + $0x8] sm:$0x3f] }
0x1509   :  { %v1658_v45 = vpop.permute.xlu1 %1657 }
0x150a   :  { %2934 = vmatmul.mubr.msk.f32.vlgmr.msra.gmra.mxu0 %vm117_vm4, %v1658_v45 }
0x150b   :  { %2950 = vmatpush3.msra.mxu0 %v3650_v21  ;;  %2957 = vmatprep.mubr.msk.f32.mxu0 %vm3197_vm0, %v3196_v5 }
0x150c   :  { %2951 = vmatprep.subr.mxu0 %v3196_v5 }
0x150d   :  { %2952 = vmatpush3.msra.mxu0 %v3655_v27 }
0x150e   :  { %2953 = vmatprep.subr.mxu0 %v3196_v5 }
0x150f   :  { %2954 = vmatpush3.msra.mxu0 %v3662_v28 }
0x1510   :  { %2955 = vmatprep.subr.mxu0 %v3196_v5 }
0x1511   :  { %2956 = vmatpush3.msra.mxu0 %v3669_v30 }
0x1512   :  { %2973 = vmatprep.subr.mxu0 %v3196_v5 }
0x15ca   :  { %v1727_v35 = vpop.f32.mrf.mxu0 }
0x15cb   :  { %v1738_v54 = vrot.slane %v1727_v35, %v3405_v57 }
0x15cc   :  { %v2935_v38 = vpop.f32.mrf.mxu0 }
0x15cd   :  { %v1739_v59 = vcombine.high %v1738_v54, %v1738_v54  ;;  %v1746_v40 = vrot.slane %v1738_v54, %v3405_v57 }
0x15cf   :  { %v1753_v41 = vrot.slane %v1739_v59, %v3405_v57  ;;  %v1757_v46 = vrot.slane %v1746_v40, %v3388_v39 }
0x15d1   :  { %v1761_v42 = vrot.slane %v1753_v41, %v3388_v39  ;;  %v1764_v48 = vadd.f32 %v1757_v46, %v3699_v47  ;;  %v3171_v46 = vld [vmem:[%s3930_s0 + $0x8] sm:$0xff] }
0x15d3   :  { %v1765_v50 = vadd.f32 %v1761_v42, %v3703_v49  ;;  %3131 = vtanh.f32 %v1764_v48  ;;  %v3747_v42 = vrot.slane %v3171_v46, 2  ;;  %v3172_v48 = vld [vmem:[%s3930_s0] sm:$0xff]  ;;  %s3205_s0 = smov [#allocation3]  }
0x15d5   :  { %3133 = vtanh.f32 %v1765_v50  ;;  %v3752_v50 = vrot.slane %v3172_v48, 2 }
0x15e0   :  { %v3132_v60 = vpop.eup %3131 }
0x15e1   :  { %v1768_v62 = vmul.f32 %v3132_v60, %v3709_v56 }
0x15e2   :  { %v3134_v51 = vpop.eup %3133 }
0x15e3   :  { %v1771_v63 = vsel %vm1770_vm8, %v1768_v62, 0.0  ;;  %v1769_v0 = vmul.f32 %v3134_v51, %v3709_v56 }
0x15e4   :  { %1772 = vadd.xlane.f32.xlu0 %v1771_v63 }
0x15e5   :  { %v1774_v1 = vsel %vm1770_vm8, %v1769_v0, 0.0 }
0x15e6   :  { %1775 = vadd.xlane.f32.xlu1 %v1774_v1 }
0x166d   :  { %v1773_v4 = vpop.xlane.xlu0 %1772 }
0x166e   :  { %v1782_v8 = vrot.slane %v1773_v4, %v3720_v58 }
0x166f   :  { %v1776_v7 = vpop.xlane.xlu1 %1775 }
0x1670   :  { %v1786_v10 = vrot.slane %v1776_v7, %v3720_v58 }
0x1672   :  { %v1787_v12 = vsel %vm518_vm5, %v1786_v10, %v1782_v8 }
0x1673   :  { %v1791_v13 = vsel %vm1789_vm9, %v1787_v12, -inf  ;;  %1790 = vst.msk [vmem:[#allocation3] sm:$0x3] %vm1789_vm9, %v1787_v12 }
0x1674   :  { %1792 = vmax.xlane.f32.xlu0 %v1791_v13 }
0x168a   :  { %1808 = vbcast.lane.b32.xlu0 %v3716_v6, 256 }
0x16fd   :  { %v1793_v9 = vpop.xlane.xlu0 %1792 }
0x16fe   :  { %v1798_v14 = vrot.slane %v1793_v9, %v3388_v39  ;;  %v1802_v15 = vrot.slane %v1793_v9, %v3430_v31 }
0x1700   :  { %vm1805_vm10 = vcmp.eq.f32.partialorder %v1773_v4, %v1798_v14  ;;  %vm1806_vm11 = vcmp.eq.f32.partialorder %v1776_v7, %v1802_v15 }
0x1701   :  { %v3730_v16 = vpop.permute.xlu0 %1808 }
0x1702   :  { %v1810_v17 = vsel %vm1805_vm10, %v3730_v16, 6  ;;  %v1811_v18 = vsel %vm1806_vm11, %v3730_v16, 6 }
0x1703   :  { %1813 = vperm.xlu1 %3022, %v1810_v17  }
0x1707   :  { %1816 = vperm.xlu1 %3022, %v1811_v18  }
0x177e   :  { %v1814_v19 = vpop.permute.xlu1 %1813 }
0x177f   :  { %v1821_v22 = vrot.slane %v1814_v19, %v3720_v58 }
0x1782   :  { %v1817_v20 = vpop.permute.xlu1 %1816 }
0x1783   :  { %v1825_v23 = vrot.slane %v1817_v20, %v3720_v58 }
0x1785   :  { %v1826_v25 = vsel %vm518_vm5, %v1825_v23, %v1821_v22 }
0x1786   :  { %v1827_v26 = vsel %vm1789_vm9, %v1826_v25, 2147483647 }
0x1787   :  { %v1829_v3 = vshra.s32 %v1827_v26, 16  ;;  %v1828_v33 = vand.u32 65535, %v1827_v26 }
0x1789   :  { %v1831_v34 = vcvt.s32.f32 %v1829_v3  ;;  %v1830_v29 = vcvt.s32.f32 %v1828_v33 }
0x178b   :  { %1832 = vmin.xlane.f32.xlu0 %v1831_v34 }
0x1814   :  { %v1833_v36 = vpop.xlane.xlu0 %1832 }
0x1815   :  { %vm1834_vm12 = vcmp.eq.f32.partialorder %v1831_v34, %v1833_v36  ;;  %v1839_v37 = vcvt.f32.s32 %v1833_v36 }
0x1816   :  { %v1835_v43 = vsel %vm1834_vm12, %v1830_v29, inf }
0x1817   :  { %1836 = vmin.xlane.f32.xlu1 %v1835_v43  ;;  %v1840_v35 = vshll.u32 %v1839_v37, 16 }
0x18a0   :  { %v1837_v45 = vpop.xlane.xlu1 %1836 }
0x18a1   :  { %v1838_v54 = vcvt.f32.s32 %v1837_v45 }
0x18a3   :  { %v1841_v38 = vadd.s32 %v1840_v35, %v1838_v54 }
0x18a5   :  { %vm1842_vm13 = vcmp.eq.s32.totalorder %v3716_v6, %v1841_v38 }
0x18a6   :  { %v2806_v59 = vsel %vm1842_vm13, 1.0, %v3196_v5 }
0x18a7   :  { %v1855_v40 = vrot.slane %v2806_v59, %v3430_v31  ;;  %v1848_v41 = vrot.slane %v2806_v59, %v3388_v39 }
0x18a9   :  { %1857 = vbcast.lane.b32.xlu1 %v1855_v40, 256  ;;  %1850 = vbcast.lane.b32.xlu0 %v1848_v41, 256 }
0x18ad   :  { %1884 = vrot.lane.b32.xlu0 %v3675_v32, %s3203_s9 }
0x191b   :  { %v1858_v60 = vpop.permute.xlu1 %1857  ;;  %v1851_v62 = vpop.permute.xlu0 %1850 }
0x191c   :  { %v1864_v51 = vmul.f32 %v3747_v42, %v1858_v60  ;;  %v1863_v63 = vmul.f32 %v3752_v50, %v1851_v62 }
0x191e   :  { %v1873_v32 = vsel %vm1865_vm14, %v1864_v51, 0.0  ;;  %v1866_v0 = vsel %vm1865_vm14, %v1863_v63, 0.0 }
0x191f   :  { %v1874_v1 = vrot.slane %v1873_v32, 4  ;;  %v1867_v4 = vrot.slane %v1866_v0, 4  ;;  %v1885_v19 = vpop.permute.xlu0 %1884 }
0x1921   :  { %v1875_v7 = vadd.f32 %v1874_v1, %v1873_v32  ;;  %v1868_v8 = vadd.f32 %v1867_v4, %v1866_v0 }
0x1923   :  { %v1876_v10 = vrot.slane %v1875_v7, 2  ;;  %v1869_v12 = vrot.slane %v1868_v8, 2 }
0x1925   :  { %v1877_v13 = vadd.f32 %v1876_v10, %v1875_v7  ;;  %v1870_v2 = vadd.f32 %v1869_v12, %v1868_v8 }
0x1927   :  { %v1878_v9 = vrot.slane %v1877_v13, 1  ;;  %v1871_v14 = vrot.slane %v1870_v2, 1 }
0x1929   :  { %v1879_v15 = vadd.f32 %v1878_v9, %v1877_v13  ;;  %v1872_v17 = vadd.f32 %v1871_v14, %v1870_v2 }
0x192b   :  { %v1882_v18 = vsel %vm518_vm5, %v1879_v15, %v1872_v17 }
0x192c   :  { %v1887_v20 = vsel %vm27_vm1, %v1882_v18, %v1885_v19 }
0x192d   :  { %2947 = vmatmul.mubr.msk.f32.vlgmr.msra.gmra.mxu1 %vm1546_vm7, %v1887_v20 }
0x192e   :  { %2961 = vmatpush3.msra.mxu1 %v3576_v44  ;;  %2970 = vmatprep.mubr.msk.f32.mxu1 %vm3197_vm0, %v3196_v5 }
0x192f   :  { %2962 = vmatprep.subr.mxu1 %v3196_v5 }
0x1930   :  { %2963 = vmatpush3.msra.mxu1 %v3581_v52 }
0x1931   :  { %2964 = vmatprep.subr.mxu1 %v3196_v5 }
0x1932   :  { %2965 = vmatpush3.msra.mxu1 %v3588_v53 }
0x1933   :  { %2966 = vmatprep.subr.mxu1 %v3196_v5 }
0x1934   :  { %2967 = vmatpush3.msra.mxu1 %v3595_v55 }
0x1935   :  { %2968 = vmatprep.subr.mxu1 %v3196_v5 }
0x1936   :  { %2969 = vmatpush3.msra.mxu1 %v3606_v61 }
0x1937   :  { %2984 = vmatprep.subr.mxu1 %v3196_v5 }
0x19ed   :  { %v1957_v22 = vpop.f32.mrf.mxu1 }
0x19ee   :  { %v1958_v23 = vadd.f32 %v1957_v22, %v3634_v11 }
0x19ef   :  { %v2948_v25 = vpop.f32.mrf.mxu1 }
0x19f0   :  { %3135 = vtanh.f32 %v1958_v23  ;;  %v2808_v3 = vmul.f32 -1.442695, %v1958_v23 }
0x19f2   :  { %3137 = vpow2.f32 %v2808_v3 }
0x19fd   :  { %v3136_v26 = vpop.eup %3135 }
0x19fe   :  { %1970 = vrot.lane.b32.xlu1 %v3136_v26, %s3200_s25 }
0x19ff   :  { %v3138_v34 = vpop.eup %3137 }
0x1a00   :  { %v1964_v33 = vadd.f32 1.0, %v3138_v34 }
0x1a02   :  { %3139 = vrcp.f32 %v1964_v33 }
0x1a0f   :  { %v3140_v36 = vpop.eup %3139 }
0x1a10   :  { %v1968_v37 = vmul.f32 %v3140_v36, %v3640_v24 }
0x1a70   :  { %v1971_v29 = vpop.permute.xlu1 %1970 }
0x1a71   :  { %v1973_v43 = vmul.f32 %v3140_v36, %v1971_v29 }
0x1a73   :  { %1975 = vrot.lane.b32.xlu0 %v1973_v43, %s3201_s26 }
0x1ae5   :  { %v1976_v45 = vpop.permute.xlu0 %1975 }
0x1ae6   :  { %v3777_v35 = vadd.f32 %v1976_v45, %v1968_v37 }
0x1ae8   :  { %3141 = vtanh.f32 %v3777_v35 }
0x1af5   :  { %v3142_v54 = vpop.eup %3141 }
0x1af6   :  { %1981 = vrot.lane.b32.xlu1 %v3142_v54, %s3200_s25 }
0x1b68   :  { %v1982_v38 = vpop.permute.xlu1 %1981 }
0x1b69   :  { %v3781_v59 = vmul.f32 %v3140_v36, %v1982_v38 }
0x1b6b   :  { %1986 = vrot.lane.b32.xlu0 %v3781_v59, %s3201_s26 }
0x1bdd   :  { %v1987_v40 = vpop.permute.xlu0 %1986 }
0x1bde   :  { %2958 = vmatmul.mubr.msk.f32.vlgmr.msra.gmra.mxu0 %vm117_vm4, %v1987_v40 }
0x1bdf   :  { %2974 = vmatpush3.msra.mxu0 %v3650_v21  ;;  %2981 = vmatprep.mubr.msk.f32.mxu0 %vm3197_vm0, %v3196_v5 }
0x1be0   :  { %2975 = vmatprep.subr.mxu0 %v3196_v5 }
0x1be1   :  { %2976 = vmatpush3.msra.mxu0 %v3655_v27 }
0x1be2   :  { %2977 = vmatprep.subr.mxu0 %v3196_v5 }
0x1be3   :  { %2978 = vmatpush3.msra.mxu0 %v3662_v28 }
0x1be4   :  { %2979 = vmatprep.subr.mxu0 %v3196_v5 }
0x1be5   :  { %2980 = vmatpush3.msra.mxu0 %v3669_v30 }
0x1be6   :  { %2997 = vmatprep.subr.mxu0 %v3196_v5 }
0x1c9e   :  { %v2056_v24 = vpop.f32.mrf.mxu0 }
0x1c9f   :  { %v2067_v41 = vrot.slane %v2056_v24, %v3405_v57 }
0x1ca0   :  { %v2959_v46 = vpop.f32.mrf.mxu0 }
0x1ca1   :  { %v2068_v48 = vcombine.high %v2067_v41, %v2067_v41  ;;  %v2075_v60 = vrot.slane %v2067_v41, %v3405_v57 }
0x1ca3   :  { %v2082_v62 = vrot.slane %v2068_v48, %v3405_v57  ;;  %v2086_v51 = vrot.slane %v2075_v60, %v3388_v39 }
0x1ca5   :  { %v2090_v63 = vrot.slane %v2082_v62, %v3388_v39  ;;  %v2093_v32 = vadd.f32 %v2086_v51, %v3699_v47 }
0x1ca7   :  { %v2094_v0 = vadd.f32 %v2090_v63, %v3703_v49  ;;  %3143 = vtanh.f32 %v2093_v32 }
0x1ca9   :  { %3145 = vtanh.f32 %v2094_v0 }
0x1cb4   :  { %v3144_v1 = vpop.eup %3143 }
0x1cb5   :  { %v2097_v4 = vmul.f32 %v3144_v1, %v3709_v56 }
0x1cb6   :  { %v3146_v7 = vpop.eup %3145 }
0x1cb7   :  { %v2099_v8 = vsel %vm1770_vm8, %v2097_v4, 0.0  ;;  %v2098_v10 = vmul.f32 %v3146_v7, %v3709_v56 }
0x1cb8   :  { %2100 = vadd.xlane.f32.xlu1 %v2099_v8 }
0x1cb9   :  { %v2102_v12 = vsel %vm1770_vm8, %v2098_v10, 0.0 }
0x1cba   :  { %2103 = vadd.xlane.f32.xlu0 %v2102_v12 }
0x1d41   :  { %v2101_v13 = vpop.xlane.xlu1 %2100 }
0x1d42   :  { %v2110_v9 = vrot.slane %v2101_v13, %v3720_v58 }
0x1d43   :  { %v2104_v2 = vpop.xlane.xlu0 %2103 }
0x1d44   :  { %v2114_v14 = vrot.slane %v2104_v2, %v3720_v58 }
0x1d46   :  { %v2115_v15 = vsel %vm518_vm5, %v2114_v14, %v2110_v9 }
0x1d47   :  { %v2119_v17 = vsel %vm1789_vm9, %v2115_v15, -inf  ;;  %2118 = vst.msk [vmem:[#allocation3 + $0x2] sm:$0x3] %vm1789_vm9, %v2115_v15 }
0x1d48   :  { %2120 = vmax.xlane.f32.xlu0 %v2119_v17 }
0x1dd1   :  { %v2121_v18 = vpop.xlane.xlu0 %2120 }
0x1dd2   :  { %v2126_v19 = vrot.slane %v2121_v18, %v3388_v39  ;;  %v2130_v20 = vrot.slane %v2121_v18, %v3430_v31 }
0x1dd4   :  { %vm2134_vm15 = vcmp.eq.f32.partialorder %v2104_v2, %v2130_v20  ;;  %vm2133_vm2 = vcmp.eq.f32.partialorder %v2101_v13, %v2126_v19 }
0x1dd5   :  { %v2136_v22 = vsel %vm2134_vm15, %v3730_v16, 6  ;;  %v2135_v23 = vsel %vm2133_vm2, %v3730_v16, 6 }
0x1dd6   :  { %2141 = vperm.xlu0 %3023, %v2136_v22   ;;  %2138 = vperm.xlu1 %3022, %v2135_v23  }
0x1e51   :  { %v2142_v25 = vpop.permute.xlu0 %2141  ;;  %v2139_v26 = vpop.permute.xlu1 %2138 }
0x1e52   :  { %v2150_v3 = vrot.slane %v2142_v25, %v3720_v58  ;;  %v2146_v34 = vrot.slane %v2139_v26, %v3720_v58 }
0x1e54   :  { %v2151_v33 = vsel %vm518_vm5, %v2150_v3, %v2146_v34 }
0x1e55   :  { %v2152_v36 = vsel %vm1789_vm9, %v2151_v33, 2147483647 }
0x1e56   :  { %v2154_v29 = vshra.s32 %v2152_v36, 16  ;;  %v2153_v37 = vand.u32 65535, %v2152_v36 }
0x1e58   :  { %v2156_v43 = vcvt.s32.f32 %v2154_v29  ;;  %v2155_v54 = vcvt.s32.f32 %v2153_v37 }
0x1e5a   :  { %2157 = vmin.xlane.f32.xlu1 %v2156_v43 }
0x1ee3   :  { %v2158_v45 = vpop.xlane.xlu1 %2157 }
0x1ee4   :  { %vm2159_vm3 = vcmp.eq.f32.partialorder %v2156_v43, %v2158_v45  ;;  %v2164_v40 = vcvt.f32.s32 %v2158_v45 }
0x1ee5   :  { %v2160_v38 = vsel %vm2159_vm3, %v2155_v54, inf }
0x1ee6   :  { %2161 = vmin.xlane.f32.xlu0 %v2160_v38  ;;  %v2165_v41 = vshll.u32 %v2164_v40, 16 }
0x1f6f   :  { %v2162_v24 = vpop.xlane.xlu0 %2161 }
0x1f70   :  { %v2163_v46 = vcvt.f32.s32 %v2162_v24 }
0x1f72   :  { %v2166_v48 = vadd.s32 %v2165_v41, %v2163_v46 }
0x1f74   :  { %vm2167_vm6 = vcmp.eq.s32.totalorder %v3716_v6, %v2166_v48 }
0x1f75   :  { %v2810_v60 = vsel %vm2167_vm6, 1.0, %v3196_v5 }
0x1f76   :  { %v2173_v62 = vrot.slane %v2810_v60, %v3388_v39  ;;  %v2180_v51 = vrot.slane %v2810_v60, %v3430_v31 }
0x1f78   :  { %2175 = vbcast.lane.b32.xlu1 %v2173_v62, 256 }
0x1f7c   :  { %2182 = vbcast.lane.b32.xlu1 %v2180_v51, 256 }
0x1f80   :  { %2204 = vrot.lane.b32.xlu1 %v3781_v59, %s3203_s9 }
0x1fea   :  { %v2176_v63 = vpop.permute.xlu1 %2175 }
0x1feb   :  { %v2184_v32 = vmul.f32 %v2176_v63, %v3752_v50 }
0x1fed   :  { %v2186_v0 = vsel %vm1865_vm14, %v2184_v32, 0.0 }
0x1fee   :  { %v2187_v1 = vrot.slane %v2186_v0, 4  ;;  %v2183_v4 = vpop.permute.xlu1 %2182 }
0x1fef   :  { %v2185_v7 = vmul.f32 %v2183_v4, %v3747_v42 }
0x1ff0   :  { %v2188_v8 = vadd.f32 %v2187_v1, %v2186_v0 }
0x1ff1   :  { %v2193_v10 = vsel %vm1865_vm14, %v2185_v7, 0.0 }
0x1ff2   :  { %v2189_v12 = vrot.slane %v2188_v8, 2  ;;  %v2194_v13 = vrot.slane %v2193_v10, 4  ;;  %v2205_v22 = vpop.permute.xlu1 %2204 }
0x1ff4   :  { %v2190_v2 = vadd.f32 %v2189_v12, %v2188_v8  ;;  %v2195_v9 = vadd.f32 %v2194_v13, %v2193_v10 }
0x1ff6   :  { %v2196_v14 = vrot.slane %v2195_v9, 2  ;;  %v2191_v15 = vrot.slane %v2190_v2, 1 }
0x1ff8   :  { %v2197_v17 = vadd.f32 %v2196_v14, %v2195_v9  ;;  %v2192_v18 = vadd.f32 %v2191_v15, %v2190_v2 }
0x1ffa   :  { %v2198_v59 = vrot.slane %v2197_v17, 1 }
0x1ffc   :  { %v2199_v19 = vadd.f32 %v2198_v59, %v2197_v17 }
0x1ffe   :  { %v2202_v20 = vsel %vm518_vm5, %v2199_v19, %v2192_v18 }
0x1fff   :  { %v2207_v23 = vsel %vm27_vm1, %v2202_v20, %v2205_v22 }
0x2000   :  { %2971 = vmatmul.mubr.msk.f32.vlgmr.msra.gmra.mxu1 %vm1546_vm7, %v2207_v23 }
0x2001   :  { %2985 = vmatpush3.msra.mxu1 %v3576_v44  ;;  %2994 = vmatprep.mubr.msk.f32.mxu1 %vm3197_vm0, %v3196_v5 }
0x2002   :  { %2986 = vmatprep.subr.mxu1 %v3196_v5 }
0x2003   :  { %2987 = vmatpush3.msra.mxu1 %v3581_v52 }
0x2004   :  { %2988 = vmatprep.subr.mxu1 %v3196_v5 }
0x2005   :  { %2989 = vmatpush3.msra.mxu1 %v3588_v53 }
0x2006   :  { %2990 = vmatprep.subr.mxu1 %v3196_v5 }
0x2007   :  { %2991 = vmatpush3.msra.mxu1 %v3595_v55 }
0x2008   :  { %2992 = vmatprep.subr.mxu1 %v3196_v5 }
0x2009   :  { %2993 = vmatpush3.msra.mxu1 %v3606_v61 }
0x20c0   :  { %v2277_v44 = vpop.f32.mrf.mxu1 }
0x20c1   :  { %v2278_v25 = vadd.f32 %v2277_v44, %v3634_v11 }
0x20c2   :  { %v2972_v26 = vpop.f32.mrf.mxu1 }
0x20c3   :  { %3147 = vtanh.f32 %v2278_v25  ;;  %v2812_v52 = vmul.f32 -1.442695, %v2278_v25 }
0x20c5   :  { %3149 = vpow2.f32 %v2812_v52 }
0x20d0   :  { %v3148_v3 = vpop.eup %3147 }
0x20d1   :  { %2290 = vrot.lane.b32.xlu0 %v3148_v3, %s3200_s25 }
0x20d2   :  { %v3150_v34 = vpop.eup %3149 }
0x20d3   :  { %v2284_v53 = vadd.f32 1.0, %v3150_v34 }
0x20d5   :  { %3151 = vrcp.f32 %v2284_v53 }
0x20e2   :  { %v3152_v33 = vpop.eup %3151 }
0x20e3   :  { %v2288_v61 = vmul.f32 %v3152_v33, %v3777_v35 }
0x2143   :  { %v2291_v36 = vpop.permute.xlu0 %2290 }
0x2144   :  { %v2293_v55 = vmul.f32 %v3152_v33, %v2291_v36 }
0x2146   :  { %2295 = vrot.lane.b32.xlu1 %v2293_v55, %s3201_s26 }
0x21b8   :  { %v2296_v29 = vpop.permute.xlu1 %2295 }
0x21b9   :  { %v3848_v43 = vadd.f32 %v2296_v29, %v2288_v61 }
0x21bb   :  { %3153 = vtanh.f32 %v3848_v43 }
0x21c8   :  { %v3154_v37 = vpop.eup %3153 }
0x21c9   :  { %2301 = vrot.lane.b32.xlu1 %v3154_v37, %s3200_s25 }
0x223b   :  { %v2302_v45 = vpop.permute.xlu1 %2301 }
0x223c   :  { %v3852_v54 = vmul.f32 %v3152_v33, %v2302_v45 }
0x223e   :  { %2306 = vrot.lane.b32.xlu1 %v3852_v54, %s3201_s26 }
0x22b0   :  { %v2307_v38 = vpop.permute.xlu1 %2306 }
0x22b1   :  { %2982 = vmatmul.mubr.msk.f32.vlgmr.msra.gmra.mxu0 %vm117_vm4, %v2307_v38 }
0x22b2   :  { %2998 = vmatpush3.msra.mxu0 %v3650_v21  ;;  %3005 = vmatprep.mubr.msk.f32.mxu0 %vm3197_vm0, %v3196_v5 }
0x22b3   :  { %2999 = vmatprep.subr.mxu0 %v3196_v5 }
0x22b4   :  { %3000 = vmatpush3.msra.mxu0 %v3655_v27 }
0x22b5   :  { %3001 = vmatprep.subr.mxu0 %v3196_v5 }
0x22b6   :  { %3002 = vmatpush3.msra.mxu0 %v3662_v28 }
0x22b7   :  { %3003 = vmatprep.subr.mxu0 %v3196_v5 }
0x22b8   :  { %3004 = vmatpush3.msra.mxu0 %v3669_v30 }
0x2371   :  { %v2376_v35 = vpop.f32.mrf.mxu0 }
0x2372   :  { %v2387_v40 = vrot.slane %v2376_v35, %v3405_v57 }
0x2373   :  { %v2983_v24 = vpop.f32.mrf.mxu0 }
0x2374   :  { %v2388_v21 = vcombine.high %v2387_v40, %v2387_v40  ;;  %v2395_v41 = vrot.slane %v2387_v40, %v3405_v57 }
0x2376   :  { %v2402_v46 = vrot.slane %v2388_v21, %v3405_v57  ;;  %v2406_v48 = vrot.slane %v2395_v41, %v3388_v39 }
0x2378   :  { %v2410_v27 = vrot.slane %v2402_v46, %v3388_v39  ;;  %v2413_v60 = vadd.f32 %v2406_v48, %v3699_v47 }
0x237a   :  { %v2414_v28 = vadd.f32 %v2410_v27, %v3703_v49  ;;  %3155 = vtanh.f32 %v2413_v60 }
0x237c   :  { %3157 = vtanh.f32 %v2414_v28 }
0x2387   :  { %v3156_v30 = vpop.eup %3155 }
0x2388   :  { %v2417_v62 = vmul.f32 %v3156_v30, %v3709_v56 }
0x2389   :  { %v3158_v51 = vpop.eup %3157 }
0x238a   :  { %v2419_v63 = vsel %vm1770_vm8, %v2417_v62, 0.0  ;;  %v2418_v32 = vmul.f32 %v3158_v51, %v3709_v56 }
0x238b   :  { %2420 = vadd.xlane.f32.xlu1 %v2419_v63 }
0x238c   :  { %v2422_v0 = vsel %vm1770_vm8, %v2418_v32, 0.0 }
0x238d   :  { %2423 = vadd.xlane.f32.xlu0 %v2422_v0 }
0x2414   :  { %v2421_v1 = vpop.xlane.xlu1 %2420 }
0x2415   :  { %v2430_v7 = vrot.slane %v2421_v1, %v3720_v58 }
0x2416   :  { %v2424_v4 = vpop.xlane.xlu0 %2423 }
0x2417   :  { %v2434_v8 = vrot.slane %v2424_v4, %v3720_v58 }
0x2419   :  { %v2435_v10 = vsel %vm518_vm5, %v2434_v8, %v2430_v7 }
0x241a   :  { %v2439_v12 = vsel %vm1789_vm9, %v2435_v10, -inf  ;;  %2438 = vst.msk [vmem:[#allocation3 + $0x4] sm:$0x3] %vm1789_vm9, %v2435_v10 }
0x241b   :  { %2440 = vmax.xlane.f32.xlu1 %v2439_v12 }
0x24a4   :  { %v2441_v13 = vpop.xlane.xlu1 %2440 }
0x24a5   :  { %v2446_v2 = vrot.slane %v2441_v13, %v3388_v39  ;;  %v2450_v9 = vrot.slane %v2441_v13, %v3430_v31 }
0x24a7   :  { %vm2454_vm0 = vcmp.eq.f32.partialorder %v2424_v4, %v2450_v9  ;;  %vm2453_vm10 = vcmp.eq.f32.partialorder %v2421_v1, %v2446_v2 }
0x24a8   :  { %v2456_v14 = vsel %vm2454_vm0, %v3730_v16, 6  ;;  %v2455_v15 = vsel %vm2453_vm10, %v3730_v16, 6 }
0x24a9   :  { %2461 = vperm.xlu0 %3023, %v2456_v14   ;;  %2458 = vperm.xlu1 %3022, %v2455_v15  }
0x2524   :  { %v2462_v17 = vpop.permute.xlu0 %2461  ;;  %v2459_v59 = vpop.permute.xlu1 %2458 }
0x2525   :  { %v2470_v18 = vrot.slane %v2462_v17, %v3720_v58  ;;  %v2466_v19 = vrot.slane %v2459_v59, %v3720_v58 }
0x2527   :  { %v2471_v20 = vsel %vm518_vm5, %v2470_v18, %v2466_v19 }
0x2528   :  { %v2472_v22 = vsel %vm1789_vm9, %v2471_v20, 2147483647 }
0x2529   :  { %v2474_v23 = vshra.s32 %v2472_v22, 16  ;;  %v2473_v25 = vand.u32 65535, %v2472_v22 }
0x252b   :  { %v2476_v44 = vcvt.s32.f32 %v2474_v23  ;;  %v2475_v3 = vcvt.s32.f32 %v2473_v25 }
0x252d   :  { %2477 = vmin.xlane.f32.xlu1 %v2476_v44 }
0x25b6   :  { %v2478_v26 = vpop.xlane.xlu1 %2477 }
0x25b7   :  { %vm2479_vm11 = vcmp.eq.f32.partialorder %v2476_v44, %v2478_v26  ;;  %v2484_v52 = vcvt.f32.s32 %v2478_v26 }
0x25b8   :  { %v2480_v16 = vsel %vm2479_vm11, %v2475_v3, inf }
0x25b9   :  { %2481 = vmin.xlane.f32.xlu0 %v2480_v16  ;;  %v2485_v53 = vshll.u32 %v2484_v52, 16 }
0x2642   :  { %v2482_v34 = vpop.xlane.xlu0 %2481 }
0x2643   :  { %v2483_v33 = vcvt.f32.s32 %v2482_v34 }
0x2645   :  { %v2486_v36 = vadd.s32 %v2485_v53, %v2483_v33 }
0x2647   :  { %vm2487_vm12 = vcmp.eq.s32.totalorder %v3716_v6, %v2486_v36 }
0x2648   :  { %v2814_v55 = vsel %vm2487_vm12, 1.0, %v3196_v5 }
0x2649   :  { %v2500_v61 = vrot.slane %v2814_v55, %v3430_v31  ;;  %v2493_v29 = vrot.slane %v2814_v55, %v3388_v39 }
0x264b   :  { %2502 = vbcast.lane.b32.xlu0 %v2500_v61, 256  ;;  %2495 = vbcast.lane.b32.xlu1 %v2493_v29, 256 }
0x264f   :  { %2524 = vrot.lane.b32.xlu1 %v3852_v54, %s3203_s9 }
0x26bd   :  { %v2503_v37 = vpop.permute.xlu0 %2502  ;;  %v2496_v45 = vpop.permute.xlu1 %2495 }
0x26be   :  { %v2505_v38 = vmul.f32 %v2503_v37, %v3747_v42  ;;  %v2504_v35 = vmul.f32 %v2496_v45, %v3752_v50 }
0x26c0   :  { %v2513_v40 = vsel %vm1865_vm14, %v2505_v38, 0.0  ;;  %v2506_v6 = vsel %vm1865_vm14, %v2504_v35, 0.0 }
0x26c1   :  { %v2514_v5 = vrot.slane %v2513_v40, 4  ;;  %v2507_v24 = vrot.slane %v2506_v6, 4  ;;  %v2525_v62 = vpop.permute.xlu1 %2524 }
0x26c3   :  { %v2515_v31 = vadd.f32 %v2514_v5, %v2513_v40  ;;  %v2508_v21 = vadd.f32 %v2507_v24, %v2506_v6 }
0x26c5   :  { %v2516_v41 = vrot.slane %v2515_v31, 2  ;;  %v2509_v46 = vrot.slane %v2508_v21, 2 }
0x26c7   :  { %v2517_v48 = vadd.f32 %v2516_v41, %v2515_v31  ;;  %v2510_v27 = vadd.f32 %v2509_v46, %v2508_v21 }
0x26c9   :  { %v2518_v60 = vrot.slane %v2517_v48, 1  ;;  %v2511_v54 = vrot.slane %v2510_v27, 1 }
0x26cb   :  { %v2519_v28 = vadd.f32 %v2518_v60, %v2517_v48  ;;  %v2512_v30 = vadd.f32 %v2511_v54, %v2510_v27 }
0x26cd   :  { %v2522_v42 = vsel %vm518_vm5, %v2519_v28, %v2512_v30 }
0x26ce   :  { %v2527_v50 = vsel %vm27_vm1, %v2522_v42, %v2525_v62 }
0x26cf   :  { %2995 = vmatmul.mubr.msk.f32.vlgmr.msra.gmra.mxu1 %vm1546_vm7, %v2527_v50 }
0x278f   :  { %v2597_v51 = vpop.f32.mrf.mxu1 }
0x2790   :  { %v2598_v63 = vadd.f32 %v2597_v51, %v3634_v11 }
0x2791   :  { %v2996_v32 = vpop.f32.mrf.mxu1 }
0x2792   :  { %3159 = vtanh.f32 %v2598_v63  ;;  %v2816_v1 = vmul.f32 -1.442695, %v2598_v63 }
0x2794   :  { %3161 = vpow2.f32 %v2816_v1 }
0x279f   :  { %v3160_v0 = vpop.eup %3159 }
0x27a0   :  { %2610 = vrot.lane.b32.xlu1 %v3160_v0, %s3200_s25 }
0x27a1   :  { %v3162_v4 = vpop.eup %3161 }
0x27a2   :  { %v2604_v7 = vadd.f32 1.0, %v3162_v4 }
0x27a4   :  { %3163 = vrcp.f32 %v2604_v7 }
0x27b1   :  { %v3164_v8 = vpop.eup %3163 }
0x27b2   :  { %v2608_v13 = vmul.f32 %v3164_v8, %v3848_v43 }
0x2812   :  { %v2611_v10 = vpop.permute.xlu1 %2610 }
0x2813   :  { %v2613_v12 = vmul.f32 %v3164_v8, %v2611_v10 }
0x2815   :  { %2615 = vrot.lane.b32.xlu0 %v2613_v12, %s3201_s26 }
0x2887   :  { %v2616_v2 = vpop.permute.xlu0 %2615 }
0x2888   :  { %v2618_v9 = vadd.f32 %v2616_v2, %v2608_v13 }
0x288a   :  { %3165 = vtanh.f32 %v2618_v9 }
0x2897   :  { %v3166_v11 = vpop.eup %3165 }
0x2898   :  { %2621 = vrot.lane.b32.xlu1 %v3166_v11, %s3200_s25  ;;  %s2764_s25 = sshll.u32 %s3205_s0, 4  ;;  %s2765_s25 = int_to_ptr.vmem [resolvable:$true] %s2764_s25 }
0x2899   :  { %s3173_s29 = scalar_lea.vmem %s2765_s25, 128  ;;  %p3178_p1 = scmp.lt.s32.totalorder %s2765_s25, %s2765_s25 }
0x289a   :  { %p3174_p0 = scmp.ne.s32.totalorder %s2765_s25, %s3173_s29  ;;  %p3179_p2 = scmp.lt.s32.totalorder %s3173_s29, %s3173_s29 }
0x289c   :  { %p3180_p3 = por %p3179_p2, %p3178_p1 }
0x289e   :  { %p3181_p4 = pnand %p3180_p3, %p3174_p0 }
0x290a   :  { %v2622_v14 = vpop.permute.xlu1 %2621 }
0x290b   :  { %v2624_v15 = vmul.f32 %v3164_v8, %v2622_v14 }
0x290d   :  { %2626 = vrot.lane.b32.xlu0 %v2624_v15, %s3201_s26 }
0x297f   :  { %v2627_v17 = vpop.permute.xlu0 %2626 }
0x2980   :  { %3006 = vmatmul.mubr.msk.f32.vlgmr.msra.gmra.mxu0 %vm117_vm4, %v2627_v17 }
0x2a40   :  { %v2696_v59 = vpop.f32.mrf.mxu0 }
0x2a41   :  { %v2707_v18 = vrot.slane %v2696_v59, %v3405_v57 }
0x2a42   :  { %v3007_v19 = vpop.f32.mrf.mxu0 }
0x2a43   :  { %v2708_v20 = vcombine.high %v2707_v18, %v2707_v18  ;;  %v2715_v43 = vrot.slane %v2707_v18, %v3405_v57 }
0x2a45   :  { %v2722_v22 = vrot.slane %v2708_v20, %v3405_v57  ;;  %v2726_v23 = vrot.slane %v2715_v43, %v3388_v39 }
0x2a47   :  { %v2730_v44 = vrot.slane %v2722_v22, %v3388_v39  ;;  %v2733_v25 = vadd.f32 %v2726_v23, %v3699_v47 }
0x2a49   :  { %v2734_v26 = vadd.f32 %v2730_v44, %v3703_v49  ;;  %3167 = vtanh.f32 %v2733_v25 }
0x2a4b   :  { %3169 = vtanh.f32 %v2734_v26 }
0x2a56   :  { %v3168_v3 = vpop.eup %3167 }
0x2a57   :  { %v2737_v16 = vmul.f32 %v3168_v3, %v3709_v56 }
0x2a58   :  { %v3170_v52 = vpop.eup %3169 }
0x2a59   :  { %v2739_v34 = vsel %vm1770_vm8, %v2737_v16, 0.0  ;;  %v2738_v53 = vmul.f32 %v3170_v52, %v3709_v56 }
0x2a5a   :  { %2740 = vadd.xlane.f32.xlu1 %v2739_v34 }
0x2a5b   :  { %v2742_v57 = vsel %vm1770_vm8, %v2738_v53, 0.0 }
0x2a5c   :  { %2743 = vadd.xlane.f32.xlu0 %v2742_v57 }
0x2ae3   :  { %v2741_v33 = vpop.xlane.xlu1 %2740 }
0x2ae4   :  { %v2750_v47 = vrot.slane %v2741_v33, %v3720_v58 }
0x2ae5   :  { %v2744_v39 = vpop.xlane.xlu0 %2743 }
0x2ae6   :  { %v2754_v49 = vrot.slane %v2744_v39, %v3720_v58 }
0x2ae8   :  { %v2755_v36 = vsel %vm518_vm5, %v2754_v49, %v2750_v47 }
0x2ae9   :  { %2758 = vst.msk [vmem:[#allocation3 + $0x6] sm:$0x3] %vm1789_vm9, %v2755_v36 }
0x2aea   :  { %3184 = shalt.err (!%p3181_p4)
}
0x2aeb   :  { %s3206_s30 = smov 2  }
0x2aec   :  { %2770 = dma.vmem_to_hbm [thread:$0]  %s2765_s25, 128, %s3932_s2, [#allocation4], %s3201_s26, %s3201_s26, %s3206_s30  }
0x2aed   :  { %3193 = dma.done.wait [#allocation4], 128  }
0x2aee   :  { %3194 = vsyncadd [#allocation4], 4294967168 }
0x2aef   :  { %2774 = vsyncpa [#allocation4], 1 }

</bundles_post_ra>
